<compile_context>
chip_gen: v5e
topology: v5e:2x2
jax: 0.10.0
libtpu: 0.0.40
codegen_flags: <defaults>
</compile_context>

<pallas_src>
import jax
import jax.numpy as jnp
from jax.experimental import pallas as pl
from jax.experimental.pallas import tpu as pltpu

ENCODER_DIM = 100
LABEL_DIM = 2
INPUT_DIM = ENCODER_DIM + LABEL_DIM  # 102
H1, H2, H3 = 1024, 128, 64
OUTPUT_DIM = 5
BN_EPS = 1e-5


def _bn_relu(h, gamma, beta):
    """Training-mode BatchNorm1d + ReLU, folded into a per-feature FMA.

    Two-pass (centered) biased batch variance, matching PyTorch's
    normalization in training mode. All math in f32.
    """
    inv_b = 1.0 / h.shape[0]
    mean = jnp.sum(h, axis=0, keepdims=True) * inv_b          # (1, N)
    centered = h - mean
    var = jnp.sum(centered * centered, axis=0, keepdims=True) * inv_b
    scale = gamma * jax.lax.rsqrt(var + BN_EPS)                # (1, N)
    return jnp.maximum(centered * scale + beta, 0.0)


def generator_kernel(
    inp_ref, lab_ref,
    w1a_ref, w1b_ref, g1_ref, be1_ref,
    w2_ref, g2_ref, be2_ref,
    w3_ref, g3_ref, be3_ref,
    w4_ref, b4_ref,
    out_ref,
):
    f32 = jnp.float32
    bf16 = jnp.bfloat16

    # Layer 1: Linear(102 -> 1024) + BN + ReLU.
    # torch.cat([input, label], 1) @ W1 is fused as:
    #   encoder part: native bf16 x bf16 -> f32 MXU dot (no weight upcast);
    #   label part (K=2): two VPU broadcast-FMAs instead of a padded MXU dot.
    # The Linear bias is omitted: training-mode BN cancels it exactly.
    h = jnp.dot(inp_ref[...], w1a_ref[...], preferred_element_type=f32)
    lab = lab_ref[...].astype(f32)          # (B, 2) bf16-rounded values
    w1b = w1b_ref[...]                      # (2, H1) f32
    h = h + lab[:, 0:1] * w1b[0:1, :]
    h = h + lab[:, 1:2] * w1b[1:2, :]
    h = _bn_relu(h, g1_ref[...], be1_ref[...])

    # Layer 2: Linear(1024 -> 128) + BN + ReLU (bias omitted, same reason).
    h = jnp.dot(h.astype(bf16), w2_ref[...], preferred_element_type=f32)
    h = _bn_relu(h, g2_ref[...], be2_ref[...])

    # Layer 3: Linear(128 -> 64) + BN + ReLU (bias omitted).
    h = jnp.dot(h.astype(bf16), w3_ref[...], preferred_element_type=f32)
    h = _bn_relu(h, g3_ref[...], be3_ref[...])

    # Layer 4: Linear(64 -> 5) + Sigmoid. Kept fully f32 (feeds sigmoid,
    # tiny dot); bias kept — no BN follows.
    z = jnp.dot(h, w4_ref[...], preferred_element_type=f32) + b4_ref[...]
    out_ref[...] = jax.nn.sigmoid(z)


def init_params(key):
    """PyTorch-default-style init.

    Linear: U(-1/sqrt(fan_in), 1/sqrt(fan_in)) for weight and bias;
    BatchNorm1d: gamma=1, beta=0.
    Weights are stored pre-transposed (in_features, out_features). w1..w3 are
    bf16 (MXU fast path; both kernel and reference consume the same
    bf16-rounded values). w4, w1b, biases and BN params stay f32.
    """
    dims = [(INPUT_DIM, H1), (H1, H2), (H2, H3), (H3, OUTPUT_DIM)]
    params = {}
    for idx, (din, dout) in enumerate(dims, start=1):
        key, kw, kb = jax.random.split(key, 3)
        bound = 1.0 / (din ** 0.5)
        w = jax.random.uniform(kw, (din, dout), jnp.float32, -bound, bound)
        params[f"w{idx}"] = w.astype(jnp.bfloat16)
        params[f"b{idx}"] = jax.random.uniform(
            kb, (1, dout), jnp.float32, -bound, bound)
    # Final layer weight stays f32 (tiny, precision-sensitive path).
    params["w4"] = params["w4"].astype(jnp.float32)
    # Pre-split w1: encoder rows go to the MXU (bf16), the two label rows are
    # consumed by the VPU FMA (upcast once to f32, only 8 KB).
    params["w1a"] = params["w1"][:ENCODER_DIM]                       # (100,1024) bf16
    params["w1b"] = params["w1"][ENCODER_DIM:].astype(jnp.float32)   # (2,1024)   f32
    for idx, dout in enumerate([H1, H2, H3], start=1):
        params[f"g{idx}"] = jnp.ones((1, dout), jnp.float32)
        params[f"be{idx}"] = jnp.zeros((1, dout), jnp.float32)
    return params


def generator_forward(inp, label, params):
    B = inp.shape[0]
    operands = [
        inp.astype(jnp.bfloat16), label.astype(jnp.bfloat16),
        params["w1a"], params["w1b"], params["g1"], params["be1"],
        params["w2"], params["g2"], params["be2"],
        params["w3"], params["g3"], params["be3"],
        params["w4"], params["b4"],
    ]
    vmem_spec = pl.BlockSpec(memory_space=pltpu.MemorySpace.VMEM)

    # Size the scoped-VMEM limit to the actual footprint (headroom for
    # double-buffered inputs / temporaries); floor 8 MiB, cap 32 MiB
    # (safely under v7x's 64 MiB physical VMEM, above v5e's 16 MiB default).
    weight_bytes = (2 * (ENCODER_DIM * H1 + H1 * H2 + H2 * H3)      # bf16
                    + 4 * (LABEL_DIM * H1 + H3 * OUTPUT_DIM))       # f32
    act_bytes = 4 * B * (INPUT_DIM + 2 * H1 + 2 * H2 + 2 * H3 + OUTPUT_DIM)
    vmem_limit = min(max(4 * (weight_bytes + act_bytes), 8 << 20), 32 << 20)

    return pl.pallas_call(
        generator_kernel,
        out_shape=jax.ShapeDtypeStruct((B, OUTPUT_DIM), jnp.float32),
        in_specs=[vmem_spec] * len(operands),
        out_specs=vmem_spec,
        compiler_params=pltpu.CompilerParams(vmem_limit_bytes=vmem_limit),
    )(*operands)


def reference_forward(inp, label, params):
    """Pure-JAX reference with full PyTorch semantics (biases included,
    two-pass biased batch variance), under the same precision policy as the
    kernel: bf16-rounded weights (w1..w3) and bf16-rounded activations feeding
    the large matmuls; f32 everywhere else."""
    f32, bf16 = jnp.float32, jnp.bfloat16
    x = jnp.concatenate([inp, label], axis=1).astype(bf16).astype(f32)

    def bn_relu(h, g, b):
        m = jnp.mean(h, axis=0, keepdims=True)
        v = jnp.mean((h - m) ** 2, axis=0, keepdims=True)
        return jnp.maximum((h - m) / jnp.sqrt(v + BN_EPS) * g + b, 0.0)

    w1 = params["w1"].astype(f32)
    w2 = params["w2"].astype(f32)
    w3 = params["w3"].astype(f32)
    w4 = params["w4"]  # already f32

    h = bn_relu(x @ w1 + params["b1"], params["g1"], params["be1"])
    h = bn_relu(h.astype(bf16).astype(f32) @ w2 + params["b2"],
                params["g2"], params["be2"])
    h = bn_relu(h.astype(bf16).astype(f32) @ w3 + params["b3"],
                params["g3"], params["be3"])
    return jax.nn.sigmoid(h @ w4 + params["b4"])


if __name__ == "__main__":
    key = jax.random.PRNGKey(0)
    kp, ki, kl = jax.random.split(key, 3)

    params = init_params(kp)

    B = 8
    inp = jax.random.normal(ki, (B, ENCODER_DIM), jnp.float32)
    # conditional-GAN-style 2-dim label vector
    label = jax.random.uniform(kl, (B, LABEL_DIM), jnp.float32)

    out = generator_forward(inp, label, params)
    out = jax.block_until_ready(out)

    ref = reference_forward(inp, label, params)
    assert out.shape == (B, OUTPUT_DIM)
    assert jnp.allclose(out, ref, atol=1e-4, rtol=1e-4), (
        float(jnp.max(jnp.abs(out - ref))))

    print("KERNEL_OK")
</pallas_src>

<mosaic_0001>
module attributes {stable_mosaic.version = 11 : i64} {
  func.func @generator_kernel(%arg0: memref<8x100xbf16, #tpu.memory_space<vmem>>, %arg1: memref<8x2xbf16, #tpu.memory_space<vmem>>, %arg2: memref<100x1024xbf16, #tpu.memory_space<vmem>>, %arg3: memref<2x1024xf32, #tpu.memory_space<vmem>>, %arg4: memref<1x1024xf32, #tpu.memory_space<vmem>>, %arg5: memref<1x1024xf32, #tpu.memory_space<vmem>>, %arg6: memref<1024x128xbf16, #tpu.memory_space<vmem>>, %arg7: memref<1x128xf32, #tpu.memory_space<vmem>>, %arg8: memref<1x128xf32, #tpu.memory_space<vmem>>, %arg9: memref<128x64xbf16, #tpu.memory_space<vmem>>, %arg10: memref<1x64xf32, #tpu.memory_space<vmem>>, %arg11: memref<1x64xf32, #tpu.memory_space<vmem>>, %arg12: memref<64x5xf32, #tpu.memory_space<vmem>>, %arg13: memref<1x5xf32, #tpu.memory_space<vmem>>, %arg14: memref<8x5xf32, #tpu.memory_space<vmem>>) attributes {dimension_semantics = [], scalar_prefetch = 0 : i64, scratch_operands = 0 : i64, tpu.core_type = #tpu.core_type<tc>} {
    %c0 = arith.constant 0 : index
    %c0_0 = arith.constant 0 : index
    %0 = vector.load %arg0[%c0, %c0_0] : memref<8x100xbf16, #tpu.memory_space<vmem>>, vector<8x100xbf16>
    %c0_1 = arith.constant 0 : index
    %c0_2 = arith.constant 0 : index
    %1 = vector.load %arg2[%c0_1, %c0_2] : memref<100x1024xbf16, #tpu.memory_space<vmem>>, vector<100x1024xbf16>
    %cst = arith.constant dense<0.000000e+00> : vector<8x1024xf32>
    %2 = tpu.matmul %0, %1, %cst {dimension_numbers = #tpu.dot_dimension_numbers<[1], [0], [0], [1], [0, 0, 1, 1], [], []>} : vector<8x100xbf16>, vector<100x1024xbf16>, vector<8x1024xf32> -> vector<8x1024xf32>
    %c0_3 = arith.constant 0 : index
    %c0_4 = arith.constant 0 : index
    %3 = vector.load %arg1[%c0_3, %c0_4] : memref<8x2xbf16, #tpu.memory_space<vmem>>, vector<8x2xbf16>
    %4 = arith.extf %3 : vector<8x2xbf16> to vector<8x2xf32>
    %c0_5 = arith.constant 0 : index
    %c0_6 = arith.constant 0 : index
    %5 = vector.load %arg3[%c0_5, %c0_6] : memref<2x1024xf32, #tpu.memory_space<vmem>>, vector<2x1024xf32>
    %6 = vector.extract_strided_slice %4 {offsets = [0, 0], sizes = [8, 1], strides = [1, 1]} : vector<8x2xf32> to vector<8x1xf32>
    %7 = vector.extract_strided_slice %5 {offsets = [0, 0], sizes = [1, 1024], strides = [1, 1]} : vector<2x1024xf32> to vector<1x1024xf32>
    %8 = vector.broadcast %6 : vector<8x1xf32> to vector<8x1024xf32>
    %9 = vector.broadcast %7 : vector<1x1024xf32> to vector<8x1024xf32>
    %10 = arith.mulf %8, %9 : vector<8x1024xf32>
    %11 = arith.addf %2, %10 : vector<8x1024xf32>
    %12 = vector.extract_strided_slice %4 {offsets = [0, 1], sizes = [8, 1], strides = [1, 1]} : vector<8x2xf32> to vector<8x1xf32>
    %13 = vector.extract_strided_slice %5 {offsets = [1, 0], sizes = [1, 1024], strides = [1, 1]} : vector<2x1024xf32> to vector<1x1024xf32>
    %14 = vector.broadcast %12 : vector<8x1xf32> to vector<8x1024xf32>
    %15 = vector.broadcast %13 : vector<1x1024xf32> to vector<8x1024xf32>
    %16 = arith.mulf %14, %15 : vector<8x1024xf32>
    %17 = arith.addf %11, %16 : vector<8x1024xf32>
    %c0_7 = arith.constant 0 : index
    %c0_8 = arith.constant 0 : index
    %18 = vector.load %arg4[%c0_7, %c0_8] : memref<1x1024xf32, #tpu.memory_space<vmem>>, vector<1x1024xf32>
    %c0_9 = arith.constant 0 : index
    %c0_10 = arith.constant 0 : index
    %19 = vector.load %arg5[%c0_9, %c0_10] : memref<1x1024xf32, #tpu.memory_space<vmem>>, vector<1x1024xf32>
    %cst_11 = arith.constant dense<0.000000e+00> : vector<1024xf32>
    %20 = vector.multi_reduction <add>, %17, %cst_11 [0] : vector<8x1024xf32> to vector<1024xf32>
    %21 = vector.shape_cast %20 : vector<1024xf32> to vector<1x1024xf32>
    %cst_12 = arith.constant 1.250000e-01 : f32
    %22 = vector.broadcast %cst_12 : f32 to vector<1x1024xf32>
    %23 = arith.mulf %21, %22 : vector<1x1024xf32>
    %24 = vector.broadcast %23 : vector<1x1024xf32> to vector<8x1024xf32>
    %25 = arith.subf %17, %24 : vector<8x1024xf32>
    %26 = arith.mulf %25, %25 : vector<8x1024xf32>
    %cst_13 = arith.constant dense<0.000000e+00> : vector<1024xf32>
    %27 = vector.multi_reduction <add>, %26, %cst_13 [0] : vector<8x1024xf32> to vector<1024xf32>
    %28 = vector.shape_cast %27 : vector<1024xf32> to vector<1x1024xf32>
    %cst_14 = arith.constant 1.250000e-01 : f32
    %29 = vector.broadcast %cst_14 : f32 to vector<1x1024xf32>
    %30 = arith.mulf %28, %29 : vector<1x1024xf32>
    %cst_15 = arith.constant 9.99999974E-6 : f32
    %31 = vector.broadcast %cst_15 : f32 to vector<1x1024xf32>
    %32 = arith.addf %30, %31 : vector<1x1024xf32>
    %33 = math.rsqrt %32 : vector<1x1024xf32>
    %34 = arith.mulf %18, %33 : vector<1x1024xf32>
    %35 = vector.broadcast %34 : vector<1x1024xf32> to vector<8x1024xf32>
    %36 = arith.mulf %25, %35 : vector<8x1024xf32>
    %37 = vector.broadcast %19 : vector<1x1024xf32> to vector<8x1024xf32>
    %38 = arith.addf %36, %37 : vector<8x1024xf32>
    %cst_16 = arith.constant 0.000000e+00 : f32
    %39 = vector.broadcast %cst_16 : f32 to vector<8x1024xf32>
    %40 = arith.maximumf %38, %39 : vector<8x1024xf32>
    %41 = arith.truncf %40 : vector<8x1024xf32> to vector<8x1024xbf16>
    %c0_17 = arith.constant 0 : index
    %c0_18 = arith.constant 0 : index
    %42 = vector.load %arg6[%c0_17, %c0_18] : memref<1024x128xbf16, #tpu.memory_space<vmem>>, vector<1024x128xbf16>
    %cst_19 = arith.constant dense<0.000000e+00> : vector<8x128xf32>
    %43 = tpu.matmul %41, %42, %cst_19 {dimension_numbers = #tpu.dot_dimension_numbers<[1], [0], [0], [1], [0, 0, 1, 1], [], []>} : vector<8x1024xbf16>, vector<1024x128xbf16>, vector<8x128xf32> -> vector<8x128xf32>
    %c0_20 = arith.constant 0 : index
    %c0_21 = arith.constant 0 : index
    %44 = vector.load %arg7[%c0_20, %c0_21] : memref<1x128xf32, #tpu.memory_space<vmem>>, vector<1x128xf32>
    %c0_22 = arith.constant 0 : index
    %c0_23 = arith.constant 0 : index
    %45 = vector.load %arg8[%c0_22, %c0_23] : memref<1x128xf32, #tpu.memory_space<vmem>>, vector<1x128xf32>
    %cst_24 = arith.constant dense<0.000000e+00> : vector<128xf32>
    %46 = vector.multi_reduction <add>, %43, %cst_24 [0] : vector<8x128xf32> to vector<128xf32>
    %47 = vector.shape_cast %46 : vector<128xf32> to vector<1x128xf32>
    %cst_25 = arith.constant 1.250000e-01 : f32
    %48 = vector.broadcast %cst_25 : f32 to vector<1x128xf32>
    %49 = arith.mulf %47, %48 : vector<1x128xf32>
    %50 = vector.broadcast %49 : vector<1x128xf32> to vector<8x128xf32>
    %51 = arith.subf %43, %50 : vector<8x128xf32>
    %52 = arith.mulf %51, %51 : vector<8x128xf32>
    %cst_26 = arith.constant dense<0.000000e+00> : vector<128xf32>
    %53 = vector.multi_reduction <add>, %52, %cst_26 [0] : vector<8x128xf32> to vector<128xf32>
    %54 = vector.shape_cast %53 : vector<128xf32> to vector<1x128xf32>
    %cst_27 = arith.constant 1.250000e-01 : f32
    %55 = vector.broadcast %cst_27 : f32 to vector<1x128xf32>
    %56 = arith.mulf %54, %55 : vector<1x128xf32>
    %cst_28 = arith.constant 9.99999974E-6 : f32
    %57 = vector.broadcast %cst_28 : f32 to vector<1x128xf32>
    %58 = arith.addf %56, %57 : vector<1x128xf32>
    %59 = math.rsqrt %58 : vector<1x128xf32>
    %60 = arith.mulf %44, %59 : vector<1x128xf32>
    %61 = vector.broadcast %60 : vector<1x128xf32> to vector<8x128xf32>
    %62 = arith.mulf %51, %61 : vector<8x128xf32>
    %63 = vector.broadcast %45 : vector<1x128xf32> to vector<8x128xf32>
    %64 = arith.addf %62, %63 : vector<8x128xf32>
    %cst_29 = arith.constant 0.000000e+00 : f32
    %65 = vector.broadcast %cst_29 : f32 to vector<8x128xf32>
    %66 = arith.maximumf %64, %65 : vector<8x128xf32>
    %67 = arith.truncf %66 : vector<8x128xf32> to vector<8x128xbf16>
    %c0_30 = arith.constant 0 : index
    %c0_31 = arith.constant 0 : index
    %68 = vector.load %arg9[%c0_30, %c0_31] : memref<128x64xbf16, #tpu.memory_space<vmem>>, vector<128x64xbf16>
    %cst_32 = arith.constant dense<0.000000e+00> : vector<8x64xf32>
    %69 = tpu.matmul %67, %68, %cst_32 {dimension_numbers = #tpu.dot_dimension_numbers<[1], [0], [0], [1], [0, 0, 1, 1], [], []>} : vector<8x128xbf16>, vector<128x64xbf16>, vector<8x64xf32> -> vector<8x64xf32>
    %c0_33 = arith.constant 0 : index
    %c0_34 = arith.constant 0 : index
    %70 = vector.load %arg10[%c0_33, %c0_34] : memref<1x64xf32, #tpu.memory_space<vmem>>, vector<1x64xf32>
    %c0_35 = arith.constant 0 : index
    %c0_36 = arith.constant 0 : index
    %71 = vector.load %arg11[%c0_35, %c0_36] : memref<1x64xf32, #tpu.memory_space<vmem>>, vector<1x64xf32>
    %cst_37 = arith.constant dense<0.000000e+00> : vector<64xf32>
    %72 = vector.multi_reduction <add>, %69, %cst_37 [0] : vector<8x64xf32> to vector<64xf32>
    %73 = vector.shape_cast %72 : vector<64xf32> to vector<1x64xf32>
    %cst_38 = arith.constant 1.250000e-01 : f32
    %74 = vector.broadcast %cst_38 : f32 to vector<1x64xf32>
    %75 = arith.mulf %73, %74 : vector<1x64xf32>
    %76 = vector.broadcast %75 : vector<1x64xf32> to vector<8x64xf32>
    %77 = arith.subf %69, %76 : vector<8x64xf32>
    %78 = arith.mulf %77, %77 : vector<8x64xf32>
    %cst_39 = arith.constant dense<0.000000e+00> : vector<64xf32>
    %79 = vector.multi_reduction <add>, %78, %cst_39 [0] : vector<8x64xf32> to vector<64xf32>
    %80 = vector.shape_cast %79 : vector<64xf32> to vector<1x64xf32>
    %cst_40 = arith.constant 1.250000e-01 : f32
    %81 = vector.broadcast %cst_40 : f32 to vector<1x64xf32>
    %82 = arith.mulf %80, %81 : vector<1x64xf32>
    %cst_41 = arith.constant 9.99999974E-6 : f32
    %83 = vector.broadcast %cst_41 : f32 to vector<1x64xf32>
    %84 = arith.addf %82, %83 : vector<1x64xf32>
    %85 = math.rsqrt %84 : vector<1x64xf32>
    %86 = arith.mulf %70, %85 : vector<1x64xf32>
    %87 = vector.broadcast %86 : vector<1x64xf32> to vector<8x64xf32>
    %88 = arith.mulf %77, %87 : vector<8x64xf32>
    %89 = vector.broadcast %71 : vector<1x64xf32> to vector<8x64xf32>
    %90 = arith.addf %88, %89 : vector<8x64xf32>
    %cst_42 = arith.constant 0.000000e+00 : f32
    %91 = vector.broadcast %cst_42 : f32 to vector<8x64xf32>
    %92 = arith.maximumf %90, %91 : vector<8x64xf32>
    %c0_43 = arith.constant 0 : index
    %c0_44 = arith.constant 0 : index
    %93 = vector.load %arg12[%c0_43, %c0_44] : memref<64x5xf32, #tpu.memory_space<vmem>>, vector<64x5xf32>
    %cst_45 = arith.constant dense<0.000000e+00> : vector<8x5xf32>
    %94 = tpu.matmul %92, %93, %cst_45 {dimension_numbers = #tpu.dot_dimension_numbers<[1], [0], [0], [1], [0, 0, 1, 1], [], []>} : vector<8x64xf32>, vector<64x5xf32>, vector<8x5xf32> -> vector<8x5xf32>
    %c0_46 = arith.constant 0 : index
    %c0_47 = arith.constant 0 : index
    %95 = vector.load %arg13[%c0_46, %c0_47] : memref<1x5xf32, #tpu.memory_space<vmem>>, vector<1x5xf32>
    %96 = vector.broadcast %95 : vector<1x5xf32> to vector<8x5xf32>
    %97 = arith.addf %94, %96 : vector<8x5xf32>
    %98 = arith.negf %97 : vector<8x5xf32>
    %99 = math.exp %98 : vector<8x5xf32>
    %cst_48 = arith.constant 1.000000e+00 : f32
    %100 = vector.broadcast %cst_48 : f32 to vector<8x5xf32>
    %101 = arith.addf %100, %99 : vector<8x5xf32>
    %102 = arith.divf %100, %101 : vector<8x5xf32>
    %c0_49 = arith.constant 0 : index
    %c0_50 = arith.constant 0 : index
    %103 = vector.load %arg14[%c0_49, %c0_50] : memref<8x5xf32, #tpu.memory_space<vmem>>, vector<8x5xf32>
    tpu.vector_store %arg14[%c0_49, %c0_50], %102 {strides = array<i32>} : memref<8x5xf32, #tpu.memory_space<vmem>>, vector<8x5xf32>,
    return
  }
}

</mosaic_0001>

<bundles_post_ra>
// kernel: tpu_custom_call.1
= control target key start
LH: loop header
LB: loop body
LE: loop exit
PB: predicated region body
PF: predicated region fallthrough
CT: control target
= control target key end

     0   :  { %19 = vsyncpa [#allocation3], 0  ;;  %s2995_s0 = inlined_call_operand.vmem [shape: bf16[8,100], index: 0, kind: input, shape index: {}]   ;;  %s2996_s1 = inlined_call_operand.vmem [shape: bf16[8,2], index: 1, kind: input, shape index: {}]   ;;  %s2997_s2 = inlined_call_operand.hbm [shape: bf16[100,1024], index: 2, kind: input, shape index: {}]   ;;  %s2998_s3 = inlined_call_operand.vmem [shape: f32[2,1024], index: 3, kind: input, shape index: {}]   ;;  %s2999_s4 = inlined_call_operand.vmem [shape: f32[1,1024], index: 4, kind: input, shape index: {}]   ;;  %s3000_s5 = inlined_call_operand.vmem [shape: f32[1,1024], index: 5, kind: input, shape index: {}]   ;;  %s3001_s6 = inlined_call_operand.hbm [shape: bf16[1024,128], index: 6, kind: input, shape index: {}]   ;;  %s3002_s7 = inlined_call_operand.vmem [shape: f32[1,128], index: 7, kind: input, shape index: {}]   ;;  %s3003_s8 = inlined_call_operand.vmem [shape: f32[1,128], index: 8, kind: input, shape index: {}]   ;;  %s3004_s9 = inlined_call_operand.vmem [shape: bf16[128,64], index: 9, kind: input, shape index: {}]   ;;  %s3005_s10 = inlined_call_operand.vmem [shape: f32[1,64], index: 10, kind: input, shape index: {}]   ;;  %s3006_s11 = inlined_call_operand.vmem [shape: f32[1,64], index: 11, kind: input, shape index: {}]   ;;  %s3007_s12 = inlined_call_operand.vmem [shape: f32[64,5], index: 12, kind: input, shape index: {}]   ;;  %s3008_s13 = inlined_call_operand.vmem [shape: f32[1,5], index: 13, kind: input, shape index: {}]   ;;  %s3009_s14 = inlined_call_operand.hbm [shape: f32[8,5], index: 14, kind: output, shape index: {}]  }
   0x1   :  { %20 = vsyncpa [#allocation6], 0 }
   0x2   :  { %21 = vsyncpa [#allocation4], 0  ;;  %s30_s15 = sshll.u32 %s2997_s2, 4  ;;  %s2503_s16 = smov [#allocation2]   ;;  %s31_s15 = int_to_ptr.hbm [resolvable:$true] %s30_s15 }
   0x3   :  { %s32_s17 = sshll.u32 %s2503_s16, 4  ;;  %s49_s20 = sshll.u32 %s3001_s6, 4  ;;  %s33_s17 = int_to_ptr.vmem [resolvable:$true] %s32_s17  ;;  %s50_s20 = int_to_ptr.hbm [resolvable:$true] %s49_s20 }
   0x4   :  { %s2504_s21 = smov 512   ;;  %s2505_s22 = smov 32  }
   0x5   :  { %38 = dma.hbm_to_vmem [thread:$0]  %s31_s15, 6656, %s33_s17, [#allocation3], %s2504_s21, %s2504_s21, %s2505_s22  }
   0x6   :  { %s2506_s23 = smov [#allocation5]   ;;  %s2507_s25 = smov 64  }
   0x7   :  { %s51_s24 = sshll.u32 %s2506_s23, 4  ;;  %s2508_s26 = smov 4   ;;  %s52_s24 = int_to_ptr.vmem [resolvable:$true] %s51_s24 }
   0x8   :  { %57 = dma.hbm_to_vmem [thread:$0]  %s50_s20, 8192, %s52_s24, [#allocation6], %s2507_s25, %s2507_s25, %s2508_s26  }
   0x9   :  { %2497 = dma.done.wait [#allocation3], 6656  }
   0xa   :  { %2498 = vsyncadd [#allocation3], 4294960640 }
   0xb   :  { %2499 = dma.done.wait [#allocation6], 8192  }
   0xc   :  { %2500 = vsyncadd [#allocation6], 4294959104  ;;  %v130_v0 = vld [vmem:[#allocation2 + $0x180] sm:$0x33]  ;;  %v2593_v1 = vld [vmem:[#allocation2 + $0x188] sm:$0x33] }
   0xd   :  { %v325_v2 = vunpack.c.l.b16 %v130_v0  ;;  %v326_v3 = vunpack.c.h.b16 %v130_v0  ;;  %v328_v4 = vunpack.c.h.b16 %v2593_v1  ;;  %vm441_vm0 = vcmask 1041408   ;;  %v1939_v5 = vld [vmem:[#allocation2 + $0x140] sm:$0xf]  ;;  %v2307_v10 = vld [vmem:[#allocation2 + $0x144] sm:$0xf] }
   0xe   :  { %v2311_v9 = vld [vmem:[#allocation2 + $0x15c] sm:$0xf0]  ;;  %v1941_v11 = vld [vmem:[#allocation2 + $0x160] sm:$0xf0]  ;;  %v2308_v12 = vld [vmem:[#allocation2 + $0x14c] sm:$0xf]  ;;  %v327_v58 = vunpack.c.l.b16 %v2593_v1 }
   0xf   :  { %v381_v6 = vpack.c.b16 %v325_v2, %v325_v2  ;;  %v382_v7 = vpack.c.b16 %v326_v3, %v326_v3  ;;  %v384_v8 = vpack.c.b16 %v328_v4, %v328_v4  ;;  %v1949_v13 = vld [vmem:[#allocation2 + $0x168] sm:$0xf0]  ;;  %v1940_v17 = vor.u32 %v2311_v9, %v1939_v5  ;;  %v1907_v19 = vld [vmem:[#allocation2 + $0x100] sm:$0xf]  ;;  %v2299_v22 = vld [vmem:[#allocation2 + $0x104] sm:$0xf] }
  0x10   :  { %v1944_v18 = vor.u32 %v2307_v10, %v1941_v11  ;;  %v2303_v20 = vld [vmem:[#allocation2 + $0x11c] sm:$0xf0]  ;;  %v1952_v21 = vor.u32 %v2308_v12, %v1949_v13  ;;  %v1909_v23 = vld [vmem:[#allocation2 + $0x120] sm:$0xf0]  ;;  %v2599_v24 = vld [vmem:[#allocation2 + $0x190] sm:$0x33]  ;;  %v383_v12 = vpack.c.b16 %v327_v58, %v327_v58 }
  0x11   :  { %v443_v14 = vsel %vm441_vm0, %v381_v6, 0  ;;  %v446_v15 = vsel %vm441_vm0, %v382_v7, 0  ;;  %v452_v16 = vsel %vm441_vm0, %v384_v8, 0  ;;  %v2300_v25 = vld [vmem:[#allocation2 + $0x10c] sm:$0xf]  ;;  %v329_v27 = vunpack.c.l.b16 %v2599_v24 }
  0x12   :  { %467 = vmatpush.bf16.msra.mxu2 %v443_v14  ;;  %480 = vmatpush.bf16.msra.mxu1 %v446_v15  ;;  %v1917_v26 = vld [vmem:[#allocation2 + $0x128] sm:$0xf0]  ;;  %v1908_v28 = vor.u32 %v2303_v20, %v1907_v19  ;;  %v1912_v29 = vor.u32 %v2299_v22, %v1909_v23  ;;  %v1875_v30 = vld [vmem:[#allocation2 + $0xc0] sm:$0xf]  ;;  %v1955_v32 = vld [vmem:[#allocation2 + $0x150] sm:$0xf]  ;;  %v330_v1 = vunpack.c.h.b16 %v2599_v24 }
  0x13   :  { %506 = vmatpush.bf16.msra.mxu3 %v452_v16  ;;  %v385_v31 = vpack.c.b16 %v329_v27, %v329_v27  ;;  %v2313_v33 = vld [vmem:[#allocation2 + $0x16c] sm:$0xf0]  ;;  %v1920_v34 = vor.u32 %v2300_v25, %v1917_v26  ;;  %v2295_v35 = vld [vmem:[#allocation2 + $0xdc] sm:$0xf0]  ;;  %v2291_v36 = vld [vmem:[#allocation2 + $0xc4] sm:$0xf] }
  0x14   :  { %v1877_v37 = vld [vmem:[#allocation2 + $0xe0] sm:$0xf0]  ;;  %v2292_v38 = vld [vmem:[#allocation2 + $0xcc] sm:$0xf]  ;;  %v1956_v41 = vor.u32 %v2313_v33, %v1955_v32  ;;  %v1876_v42 = vor.u32 %v2295_v35, %v1875_v30  ;;  %v1843_v44 = vld [vmem:[#allocation2 + $0x80] sm:$0xf] }
  0x15   :  { %v1885_v39 = vld [vmem:[#allocation2 + $0xe8] sm:$0xf0]  ;;  %v455_v40 = vsel %vm441_vm0, %v385_v31, 0  ;;  %v1880_v43 = vor.u32 %v2291_v36, %v1877_v37  ;;  %v1923_v45 = vld [vmem:[#allocation2 + $0x110] sm:$0xf]  ;;  %v2509_v4 = vmov 0  }
  0x16   :  { %468 = vmatpush.bf16.msra.mxu2 %v1940_v17  ;;  %481 = vmatpush.bf16.msra.mxu1 %v1944_v18  ;;  %v2305_v46 = vld [vmem:[#allocation2 + $0x12c] sm:$0xf0]  ;;  %v1888_v47 = vor.u32 %v2292_v38, %v1885_v39  ;;  %v2287_v48 = vld [vmem:[#allocation2 + $0x9c] sm:$0xf0]  ;;  %v2283_v49 = vld [vmem:[#allocation2 + $0x84] sm:$0xf] }
  0x17   :  { %507 = vmatpush.bf16.msra.mxu3 %v1952_v21  ;;  %519 = vmatpush.bf16.msra.mxu0 %v455_v40  ;;  %v1845_v50 = vld [vmem:[#allocation2 + $0xa0] sm:$0xf0]  ;;  %v2284_v51 = vld [vmem:[#allocation2 + $0x8c] sm:$0xf]  ;;  %v1811_v53 = vld [vmem:[#allocation2 + $0x40] sm:$0xf]  ;;  %v1924_v55 = vor.u32 %v2305_v46, %v1923_v45  ;;  %v1844_v56 = vor.u32 %v2287_v48, %v1843_v44  ;;  %v386_v21 = vpack.c.b16 %v330_v1, %v330_v1 }
  0x18   :  { %v1853_v52 = vld [vmem:[#allocation2 + $0xa8] sm:$0xf0]  ;;  %v2279_v54 = vld [vmem:[#allocation2 + $0x5c] sm:$0xf0]  ;;  %v1848_v57 = vor.u32 %v2283_v49, %v1845_v50  ;;  %v2604_v59 = vld [vmem:[#allocation2 + $0x198] sm:$0x33]  ;;  %2396 = vset.pattern.permute.xlu0 %v2509_v4 }
  0x19   :  { %v1891_v60 = vld [vmem:[#allocation2 + $0xd0] sm:$0xf]  ;;  %v1856_v62 = vor.u32 %v2284_v51, %v1853_v52  ;;  %v2275_v63 = vld [vmem:[#allocation2 + $0x44] sm:$0xf]  ;;  %v2276_v2 = vld [vmem:[#allocation2 + $0x4c] sm:$0xf]  ;;  %v332_v6 = vunpack.c.h.b16 %v2604_v59  ;;  %v1812_v9 = vor.u32 %v2279_v54, %v1811_v53 }
  0x1a   :  { %469 = vmatpush.bf16.msra.mxu2 %v1908_v28  ;;  %482 = vmatpush.bf16.msra.mxu1 %v1912_v29  ;;  %v2297_v61 = vld [vmem:[#allocation2 + $0xec] sm:$0xf0]  ;;  %v1813_v0 = vld [vmem:[#allocation2 + $0x60] sm:$0xf0]  ;;  %v1821_v3 = vld [vmem:[#allocation2 + $0x68] sm:$0xf0] }
  0x1b   :  { %508 = vmatpush.bf16.msra.mxu3 %v1920_v34  ;;  %520 = vmatpush.bf16.msra.mxu0 %v1956_v41  ;;  %v2609_v5 = vld [vmem:[%s2996_s1] sm:$0xf]  ;;  %v1892_v7 = vor.u32 %v2297_v61, %v1891_v60  ;;  %v1816_v10 = vor.u32 %v2275_v63, %v1813_v0  ;;  %v1859_v13 = vld [vmem:[#allocation2 + $0x90] sm:$0xf]  ;;  %v1824_v15 = vor.u32 %v2276_v2, %v1821_v3  ;;  %v2267_v17 = vld [vmem:[#allocation2 + $0x4] sm:$0xf] }
  0x1c   :  { %v135_v8 = vunpack.c.l.bf16 %v2609_v5  ;;  %v1779_v11 = vld [vmem:[#allocation2] sm:$0xf]  ;;  %v2289_v14 = vld [vmem:[#allocation2 + $0xac] sm:$0xf0]  ;;  %v1781_v18 = vld [vmem:[#allocation2 + $0x20] sm:$0xf0]  ;;  %v388_v22 = vpack.c.b16 %v332_v6, %v332_v6 }
  0x1d   :  { %v2271_v16 = vld [vmem:[#allocation2 + $0x1c] sm:$0xf0]  ;;  %v2268_v19 = vld [vmem:[#allocation2 + $0xc] sm:$0xf]  ;;  %v1860_v23 = vor.u32 %v2289_v14, %v1859_v13  ;;  %v1784_v25 = vor.u32 %v2267_v17, %v1781_v18  ;;  %v449_v26 = vsel %vm441_vm0, %v383_v12, 0  ;;  %v458_v34 = vsel %vm441_vm0, %v386_v21, 0 }
  0x1e   :  { %470 = vmatpush.bf16.msra.mxu2 %v1876_v42  ;;  %483 = vmatpush.bf16.msra.mxu1 %v1880_v43  ;;  %v1789_v20 = vld [vmem:[#allocation2 + $0x28] sm:$0xf0]  ;;  %v1780_v24 = vor.u32 %v2271_v16, %v1779_v11  ;;  %v1947_v28 = vld [vmem:[#allocation2 + $0x148] sm:$0xf]  ;;  %v1827_v29 = vld [vmem:[#allocation2 + $0x50] sm:$0xf]  ;;  %v331_v17 = vunpack.c.l.b16 %v2604_v59 }
  0x1f   :  { %509 = vmatpush.bf16.msra.mxu3 %v1888_v47  ;;  %521 = vmatpush.bf16.msra.mxu0 %v1924_v55  ;;  %v1792_v27 = vor.u32 %v2268_v19, %v1789_v20  ;;  %v2281_v30 = vld [vmem:[#allocation2 + $0x6c] sm:$0xf0]  ;;  %v2312_v31 = vld [vmem:[#allocation2 + $0x164] sm:$0xf0]  ;;  %v2309_v32 = vld [vmem:[#allocation2 + $0x154] sm:$0xf] }
  0x20   :  { %140 = vperm.xlu0 %2396, %v135_v8   ;;  %v1957_v33 = vld [vmem:[#allocation2 + $0x170] sm:$0xf0]  ;;  %v464_v35 = vsel %vm441_vm0, %v388_v22, 0  ;;  %v2310_v36 = vld [vmem:[#allocation2 + $0x15c] sm:$0xf]  ;;  %vm437_vm1 = vcmask 818176   ;;  %v1828_v39 = vor.u32 %v2281_v30, %v1827_v29  ;;  %v1948_v40 = vor.u32 %v2312_v31, %v1947_v28 }
  0x21   :  { %v1965_v37 = vld [vmem:[#allocation2 + $0x178] sm:$0xf0]  ;;  %v2622_v38 = vld [vmem:[%s2995_s0] sm:$0xf]  ;;  %v1795_v41 = vld [vmem:[#allocation2 + $0x10] sm:$0xf]  ;;  %v1960_v43 = vor.u32 %v2309_v32, %v1957_v33 }
  0x22   :  { %471 = vmatpush.bf16.msra.mxu2 %v1844_v56  ;;  %484 = vmatpush.bf16.msra.mxu1 %v1848_v57  ;;  %v2273_v42 = vld [vmem:[#allocation2 + $0x2c] sm:$0xf0]  ;;  %v1968_v44 = vor.u32 %v2310_v36, %v1965_v37  ;;  %v1915_v45 = vld [vmem:[#allocation2 + $0x108] sm:$0xf]  ;;  %v2301_v47 = vld [vmem:[#allocation2 + $0x114] sm:$0xf] }
  0x23   :  { %510 = vmatpush.bf16.msra.mxu3 %v1856_v62  ;;  %522 = vmatpush.bf16.msra.mxu0 %v1892_v7  ;;  %v2304_v46 = vld [vmem:[#allocation2 + $0x124] sm:$0xf0]  ;;  %v1925_v48 = vld [vmem:[#allocation2 + $0x130] sm:$0xf0]  ;;  %v2302_v49 = vld [vmem:[#allocation2 + $0x11c] sm:$0xf]  ;;  %v1796_v51 = vor.u32 %v2273_v42, %v1795_v41 }
  0x24   :  { %v1933_v50 = vld [vmem:[#allocation2 + $0x138] sm:$0xf0]  ;;  %v1916_v52 = vor.u32 %v2304_v46, %v1915_v45  ;;  %v2510_v53 = vmov 1   ;;  %v1928_v54 = vor.u32 %v2301_v47, %v1925_v48  ;;  %v1883_v56 = vld [vmem:[#allocation2 + $0xc8] sm:$0xf] }
  0x25   :  { %v1936_v55 = vor.u32 %v2302_v49, %v1933_v50  ;;  %v2296_v57 = vld [vmem:[#allocation2 + $0xe4] sm:$0xf0]  ;;  %v2293_v58 = vld [vmem:[#allocation2 + $0xd4] sm:$0xf]  ;;  %v2294_v61 = vld [vmem:[#allocation2 + $0xdc] sm:$0xf] }
  0x26   :  { %472 = vmatpush.bf16.msra.mxu2 %v1812_v9  ;;  %485 = vmatpush.bf16.msra.mxu1 %v1816_v10  ;;  %v1893_v60 = vld [vmem:[#allocation2 + $0xf0] sm:$0xf0]  ;;  %v1901_v62 = vld [vmem:[#allocation2 + $0xf8] sm:$0xf0]  ;;  %v1884_v63 = vor.u32 %v2296_v57, %v1883_v56  ;;  %v1851_v3 = vld [vmem:[#allocation2 + $0x88] sm:$0xf] }
  0x27   :  { %511 = vmatpush.bf16.msra.mxu3 %v1824_v15  ;;  %523 = vmatpush.bf16.msra.mxu0 %v1860_v23  ;;  %v1896_v0 = vor.u32 %v2293_v58, %v1893_v60  ;;  %v1904_v2 = vor.u32 %v2294_v61, %v1901_v62  ;;  %v2288_v4 = vld [vmem:[#allocation2 + $0xa4] sm:$0xf0]  ;;  %v2285_v1 = vld [vmem:[#allocation2 + $0x94] sm:$0xf]  ;;  %v2286_v7 = vld [vmem:[#allocation2 + $0x9c] sm:$0xf] }
  0x28   :  { %2397 = vset.pattern.permute.xlu0 %v2510_v53  ;;  %v1861_v6 = vld [vmem:[#allocation2 + $0xb0] sm:$0xf0]  ;;  %v1869_v9 = vld [vmem:[#allocation2 + $0xb8] sm:$0xf0]  ;;  %v1852_v10 = vor.u32 %v2288_v4, %v1851_v3  ;;  %v1819_v11 = vld [vmem:[#allocation2 + $0x48] sm:$0xf] }
  0x29   :  { %571 = vperm.xlu0 %2397, %v135_v8   ;;  %v1864_v5 = vor.u32 %v2285_v1, %v1861_v6  ;;  %v1872_v8 = vor.u32 %v2286_v7, %v1869_v9  ;;  %v2280_v12 = vld [vmem:[#allocation2 + $0x64] sm:$0xf0]  ;;  %v2277_v13 = vld [vmem:[#allocation2 + $0x54] sm:$0xf]  ;;  %v2278_v15 = vld [vmem:[#allocation2 + $0x5c] sm:$0xf] }
  0x2a   :  { %473 = vmatpush.bf16.msra.mxu2 %v1780_v24  ;;  %486 = vmatpush.bf16.msra.mxu1 %v1784_v25  ;;  %v1829_v14 = vld [vmem:[#allocation2 + $0x70] sm:$0xf0]  ;;  %v1837_v16 = vld [vmem:[#allocation2 + $0x78] sm:$0xf0]  ;;  %v1820_v18 = vor.u32 %v2280_v12, %v1819_v11  ;;  %v1787_v21 = vld [vmem:[#allocation2 + $0x8] sm:$0xf] }
  0x2b   :  { %512 = vmatpush.bf16.msra.mxu3 %v1792_v27  ;;  %524 = vmatpush.bf16.msra.mxu0 %v1828_v39  ;;  %v1832_v19 = vor.u32 %v2277_v13, %v1829_v14  ;;  %v1840_v20 = vor.u32 %v2278_v15, %v1837_v16  ;;  %v2272_v22 = vld [vmem:[#allocation2 + $0x24] sm:$0xf0]  ;;  %v2269_v23 = vld [vmem:[#allocation2 + $0x14] sm:$0xf]  ;;  %v2270_v25 = vld [vmem:[#allocation2 + $0x1c] sm:$0xf]  ;;  %v387_v27 = vpack.c.b16 %v331_v17, %v331_v17 }
  0x2c   :  { %v1797_v24 = vld [vmem:[#allocation2 + $0x30] sm:$0xf0]  ;;  %v1788_v28 = vor.u32 %v2272_v22, %v1787_v21  ;;  %v1963_v31 = vld [vmem:[#allocation2 + $0x158] sm:$0xf]  ;;  %v2647_v50 = vld [vmem:[%s2998_s3] sm:$0xff] }
  0x2d   :  { %1969 = vmatmul.msk.bf16.vlgmr.msra.gmra.mxu2 %vm437_vm1, %v2622_v38  ;;  %1970 = vmatmul.msk.bf16.vlgmr.msra.gmra.mxu1 %vm437_vm1, %v2622_v38  ;;  %v1800_v29 = vor.u32 %v2269_v23, %v1797_v24  ;;  %v461_v59 = vsel %vm441_vm0, %v387_v27, 0  ;;  %v2314_v32 = vld [vmem:[#allocation2 + $0x174] sm:$0xf0]  ;;  %v145_v56 = vperm.slane %v2647_v50, 0  ;;  %v577_v62 = vperm.slane %v2647_v50, 7 }
  0x2e   :  { %493 = vmatpush.bf16.msrb.mxu2 %v449_v26  ;;  %532 = vmatpush.bf16.msrb.mxu1 %v458_v34  ;;  %v1805_v26 = vld [vmem:[#allocation2 + $0x38] sm:$0xf0]  ;;  %v1964_v33 = vor.u32 %v2314_v32, %v1963_v31  ;;  %v1931_v34 = vld [vmem:[#allocation2 + $0x118] sm:$0xf] }
  0x2f   :  { %558 = vmatpush.bf16.msrb.mxu3 %v464_v35  ;;  %525 = vmatpush.bf16.msra.mxu0 %v1796_v51  ;;  %v1808_v30 = vor.u32 %v2270_v25, %v1805_v26  ;;  %v2306_v35 = vld [vmem:[#allocation2 + $0x134] sm:$0xf0]  ;;  %v593_v9 = vperm.slane %v577_v62, 1 }
  0x30   :  { %1972 = vmatmul.msk.bf16.vlgmr.msra.gmra.mxu3 %vm437_vm1, %v2622_v38  ;;  %v1932_v36 = vor.u32 %v2306_v35, %v1931_v34  ;;  %v1899_v37 = vld [vmem:[#allocation2 + $0xd8] sm:$0xf] }
  0x31   :  { %v2298_v39 = vld [vmem:[#allocation2 + $0xf4] sm:$0xf0] }
  0x32   :  { %494 = vmatpush.bf16.msrb.mxu2 %v1948_v40  ;;  %533 = vmatpush.bf16.msrb.mxu1 %v1960_v43  ;;  %v1900_v40 = vor.u32 %v2298_v39, %v1899_v37  ;;  %v1867_v41 = vld [vmem:[#allocation2 + $0x98] sm:$0xf] }
  0x33   :  { %559 = vmatpush.bf16.msrb.mxu3 %v1968_v44  ;;  %1973 = vmatmul.msk.bf16.vlgmr.msra.gmra.mxu0 %vm437_vm1, %v2622_v38  ;;  %v2290_v42 = vld [vmem:[#allocation2 + $0xb4] sm:$0xf0] }
  0x34   :  { %v1868_v43 = vor.u32 %v2290_v42, %v1867_v41  ;;  %v1835_v44 = vld [vmem:[#allocation2 + $0x58] sm:$0xf] }
  0x35   :  { %v2282_v45 = vld [vmem:[#allocation2 + $0x74] sm:$0xf0] }
  0x36   :  { %495 = vmatpush.bf16.msrb.mxu2 %v1916_v52  ;;  %534 = vmatpush.bf16.msrb.mxu1 %v1928_v54  ;;  %v1836_v46 = vor.u32 %v2282_v45, %v1835_v44  ;;  %v1803_v47 = vld [vmem:[#allocation2 + $0x18] sm:$0xf]  ;;  %v146_v52 = vperm.slane %v2647_v50, 2  ;;  %v575_v54 = vperm.slane %v2647_v50, 3 }
  0x37   :  { %560 = vmatpush.bf16.msrb.mxu3 %v1936_v55  ;;  %v2274_v48 = vld [vmem:[#allocation2 + $0x34] sm:$0xf0]  ;;  %v2656_v55 = vld [vmem:[%s2998_s3 + $0x8] sm:$0xff] }
  0x38   :  { %v1804_v49 = vor.u32 %v2274_v48, %v1803_v47  ;;  %v162_v53 = vperm.slane %v146_v52, 0  ;;  %v591_v58 = vperm.slane %v575_v54, 1  ;;  %v149_v60 = vperm.slane %v2656_v55, 0 }
  0x39   :  { %v150_v34 = vperm.slane %v2656_v55, 2  ;;  %v579_v39 = vperm.slane %v2656_v55, 3  ;;  %v576_v47 = vperm.slane %v2647_v50, 5  ;;  %v152_v48 = vperm.slane %v2656_v55, 6 }
  0x3a   :  { %496 = vmatpush.bf16.msrb.mxu2 %v1884_v63  ;;  %535 = vmatpush.bf16.msrb.mxu1 %v1896_v0  ;;  %v161_v63 = vperm.slane %v145_v56, 0  ;;  %v574_v0 = vperm.slane %v2647_v50, 1  ;;  %v165_v7 = vperm.slane %v149_v60, 0  ;;  %v581_v56 = vperm.slane %v2656_v55, 7 }
  0x3b   :  { %561 = vmatpush.bf16.msrb.mxu3 %v1904_v2  ;;  %v578_v2 = vperm.slane %v2656_v55, 1  ;;  %v166_v42 = vperm.slane %v150_v34, 0  ;;  %v592_v62 = vperm.slane %v576_v47, 1 }
  0x3e   :  { %497 = vmatpush.bf16.msrb.mxu2 %v1852_v10  ;;  %536 = vmatpush.bf16.msrb.mxu1 %v1864_v5  ;;  %v590_v5 = vperm.slane %v574_v0, 1 }
  0x3f   :  { %562 = vmatpush.bf16.msrb.mxu3 %v1872_v8  ;;  %v594_v8 = vperm.slane %v578_v2, 1 }
  0x42   :  { %498 = vmatpush.bf16.msrb.mxu2 %v1820_v18  ;;  %537 = vmatpush.bf16.msrb.mxu1 %v1832_v19 }
  0x43   :  { %563 = vmatpush.bf16.msrb.mxu3 %v1840_v20 }
  0x46   :  { %499 = vmatpush.bf16.msrb.mxu2 %v1788_v28  ;;  %538 = vmatpush.bf16.msrb.mxu1 %v1800_v29 }
  0x47   :  { %564 = vmatpush.bf16.msrb.mxu3 %v1808_v30 }
  0x49   :  { %1971 = vmatmul.msk.bf16.vlgmr.msrb.gmra.mxu2 %vm437_vm1, %v2622_v38  ;;  %1974 = vmatmul.msk.bf16.vlgmr.msrb.gmra.mxu1 %vm437_vm1, %v2622_v38 }
  0x4a   :  { %545 = vmatpush.bf16.msra.mxu2 %v461_v59  ;;  %1976 = vmatmul.msk.bf16.vlgmr.msrb.gmra.mxu3 %vm437_vm1, %v2622_v38 }
  0x4e   :  { %546 = vmatpush.bf16.msra.mxu2 %v1964_v33 }
  0x52   :  { %547 = vmatpush.bf16.msra.mxu2 %v1932_v36 }
  0x56   :  { %548 = vmatpush.bf16.msra.mxu2 %v1900_v40 }
  0x5a   :  { %549 = vmatpush.bf16.msra.mxu2 %v1868_v43  ;;  %v147_v43 = vperm.slane %v2647_v50, 4 }
  0x5c   :  { %v163_v54 = vperm.slane %v147_v43, 0 }
  0x5e   :  { %550 = vmatpush.bf16.msra.mxu2 %v1836_v46  ;;  %v595_v46 = vperm.slane %v579_v39, 1 }
  0x62   :  { %551 = vmatpush.bf16.msra.mxu2 %v1804_v49 }
  0x65   :  { %1975 = vmatmul.msk.bf16.vlgmr.msra.gmra.mxu2 %vm437_vm1, %v2622_v38  ;;  %v148_v38 = vperm.slane %v2647_v50, 6 }
  0x67   :  { %v164_v4 = vperm.slane %v148_v38, 0 }
  0x92   :  { %v2649_v51 = vpop.permute.xlu0 %140 }
  0x93   :  { %v170_v57 = vmul.f32 %v162_v53, %v2649_v51  ;;  %v169_v10 = vmul.f32 %v161_v63, %v2649_v51  ;;  %v172_v11 = vmul.f32 %v164_v4, %v2649_v51  ;;  %v173_v13 = vmul.f32 %v165_v7, %v2649_v51 }
  0x94   :  { %v174_v53 = vmul.f32 %v166_v42, %v2649_v51  ;;  %v168_v63 = vperm.slane %v152_v48, 0  ;;  %v171_v50 = vmul.f32 %v163_v54, %v2649_v51  ;;  %v597_v4 = vperm.slane %v581_v56, 1 }
  0x9b   :  { %v2662_v61 = vpop.permute.xlu0 %571 }
  0x9c   :  { %v599_v6 = vmul.f32 %v591_v58, %v2662_v61  ;;  %v601_v15 = vmul.f32 %v593_v9, %v2662_v61  ;;  %v598_v17 = vmul.f32 %v590_v5, %v2662_v61  ;;  %v602_v19 = vmul.f32 %v594_v8, %v2662_v61 }
  0x9d   :  { %v603_v58 = vmul.f32 %v595_v46, %v2662_v61  ;;  %v600_v9 = vmul.f32 %v592_v62, %v2662_v61 }
  0xaa   :  { %v488_v3 = vpop.f32.mrf.mxu1 }
  0xab   :  { %v489_v1 = vadd.f32 %v488_v3, %v170_v57 }
  0xad   :  { %v2670_v12 = vadd.f32 %v599_v6, %v489_v1 }
  0xaf   :  { %v622_v23 = vrot.slane %v2670_v12, 4 }
  0xb0   :  { %v475_v14 = vpop.f32.mrf.mxu2  ;;  %v527_v21 = vpop.f32.mrf.mxu0 }
  0xb1   :  { %v476_v16 = vadd.f32 %v475_v14, %v169_v10  ;;  %v528_v24 = vadd.f32 %v527_v21, %v173_v13  ;;  %v623_v29 = vadd.f32 %v622_v23, %v2670_v12  ;;  %v176_v10 = vmul.f32 %v168_v63, %v2649_v51 }
  0xb2   :  { %v490_v22 = vpop.f32.mrf.mxu1 }
  0xb3   :  { %v514_v18 = vpop.f32.mrf.mxu3  ;;  %v2679_v26 = vadd.f32 %v598_v17, %v476_v16  ;;  %v2681_v27 = vadd.f32 %v602_v19, %v528_v24  ;;  %v624_v36 = vrot.slane %v623_v29, 2  ;;  %v605_v16 = vmul.f32 %v597_v4, %v2662_v61 }
  0xb4   :  { %v515_v20 = vadd.f32 %v514_v18, %v172_v11 }
  0xb5   :  { %v640_v30 = vrot.slane %v2681_v27, 4  ;;  %v616_v31 = vrot.slane %v2679_v26, 4  ;;  %v625_v44 = vadd.f32 %v624_v36, %v623_v29 }
  0xb6   :  { %v2677_v25 = vadd.f32 %v601_v15, %v515_v20 }
  0xb7   :  { %v641_v37 = vadd.f32 %v640_v30, %v2681_v27  ;;  %v617_v40 = vadd.f32 %v616_v31, %v2679_v26  ;;  %v626_v38 = vrot.slane %v625_v44, 1 }
  0xb8   :  { %v634_v28 = vrot.slane %v2677_v25, 4  ;;  %v477_v59 = vpop.f32.mrf.mxu2  ;;  %v529_v35 = vpop.f32.mrf.mxu0 }
  0xb9   :  { %v642_v45 = vrot.slane %v641_v37, 2  ;;  %v618_v49 = vrot.slane %v617_v40, 2  ;;  %v627_v1 = vadd.f32 %v626_v38, %v625_v44 }
  0xba   :  { %v635_v32 = vadd.f32 %v634_v28, %v2677_v25 }
  0xbb   :  { %v516_v33 = vpop.f32.mrf.mxu3  ;;  %v643_v57 = vadd.f32 %v642_v45, %v641_v37  ;;  %v619_v0 = vadd.f32 %v618_v49, %v617_v40  ;;  %v665_v17 = vmul.f32 0.125, %v627_v1 }
  0xbc   :  { %v636_v41 = vrot.slane %v635_v32, 2 }
  0xbd   :  { %v644_v6 = vrot.slane %v643_v57, 1  ;;  %v620_v5 = vrot.slane %v619_v0, 1  ;;  %v2703_v59 = vsub.f32 %v2670_v12, %v665_v17 }
  0xbe   :  { %v637_v52 = vadd.f32 %v636_v41, %v635_v32 }
  0xbf   :  { %v645_v18 = vadd.f32 %v644_v6, %v643_v57  ;;  %v621_v23 = vadd.f32 %v620_v5, %v619_v0  ;;  %v681_v43 = vmul.f32 %v2703_v59, %v2703_v59 }
  0xc0   :  { %v638_v2 = vrot.slane %v637_v52, 1 }
  0xc1   :  { %v668_v31 = vmul.f32 0.125, %v645_v18  ;;  %v664_v35 = vmul.f32 0.125, %v621_v23 }
  0xc2   :  { %v639_v8 = vadd.f32 %v638_v2, %v637_v52 }
  0xc3   :  { %v2711_v44 = vsub.f32 %v2681_v27, %v668_v31  ;;  %v2714_v47 = vsub.f32 %v2679_v26, %v664_v35  ;;  %v151_v26 = vperm.slane %v2656_v55, 4  ;;  %v2338_v31 = vld [vmem:[#allocation5 + $0xb8] sm:$0xff] }
  0xc4   :  { %v667_v24 = vmul.f32 0.125, %v639_v8  ;;  %1466 = vmatpush.bf16.msrb.mxu2 %v2338_v31  ;;  %v2318_v31 = vld [vmem:[#allocation5 + $0x18] sm:$0xff] }
  0xc5   :  { %v684_v54 = vmul.f32 %v2711_v44, %v2711_v44  ;;  %v680_v27 = vmul.f32 %v2714_v47, %v2714_v47 }
  0xc6   :  { %v540_v60 = vpop.f32.mrf.mxu1  ;;  %v2706_v36 = vsub.f32 %v2677_v25, %v667_v24 }
  0xc7   :  { %v541_v3 = vadd.f32 %v540_v60, %v174_v53  ;;  %v694_v53 = vrot.slane %v681_v43, 4  ;;  %v580_v60 = vperm.slane %v2656_v55, 5  ;;  %v712_v63 = vrot.slane %v684_v54, 4 }
  0xc8   :  { %v683_v25 = vmul.f32 %v2706_v36, %v2706_v36 }
  0xc9   :  { %v611_v7 = vadd.f32 %v603_v58, %v541_v3  ;;  %v695_v62 = vadd.f32 %v694_v53, %v681_v43  ;;  %v713_v8 = vadd.f32 %v712_v63, %v684_v54  ;;  %v2321_v43 = vld [vmem:[#allocation5 + $0x30] sm:$0xff]  ;;  %v2328_v63 = vld [vmem:[#allocation5 + $0x68] sm:$0xff] }
  0xca   :  { %v706_v56 = vrot.slane %v683_v25, 4 }
  0xcb   :  { %v646_v11 = vrot.slane %v611_v7, 4  ;;  %v696_v5 = vrot.slane %v695_v62, 2 }
  0xcc   :  { %v501_v13 = vpop.f32.mrf.mxu2  ;;  %v707_v4 = vadd.f32 %v706_v56, %v683_v25 }
  0xcd   :  { %v502_v14 = vadd.f32 %v501_v13, %v171_v50  ;;  %v566_v15 = vpop.f32.mrf.mxu3  ;;  %v647_v19 = vadd.f32 %v646_v11, %v611_v7  ;;  %v688_v50 = vrot.slane %v680_v27, 4 }
  0xce   :  { %v567_v21 = vadd.f32 %v566_v15, %v176_v10  ;;  %v542_v22 = vpop.f32.mrf.mxu1  ;;  %v596_v10 = vperm.slane %v580_v60, 1  ;;  %v708_v55 = vrot.slane %v707_v4, 2 }
  0xcf   :  { %v608_v20 = vadd.f32 %v600_v9, %v502_v14  ;;  %v648_v28 = vrot.slane %v647_v19, 2  ;;  %v167_v9 = vperm.slane %v151_v26, 0  ;;  %v689_v13 = vadd.f32 %v688_v50, %v680_v27 }
  0xd0   :  { %v613_v30 = vadd.f32 %v605_v16, %v567_v21  ;;  %v604_v18 = vmul.f32 %v596_v10, %v2662_v61 }
  0xd1   :  { %v628_v29 = vrot.slane %v608_v20, 4  ;;  %v649_v32 = vadd.f32 %v648_v28, %v647_v19  ;;  %v175_v17 = vmul.f32 %v167_v9, %v2649_v51  ;;  %v697_v19 = vadd.f32 %v696_v5, %v695_v62  ;;  %v2322_v28 = vld [vmem:[#allocation5 + $0x38] sm:$0xff]  ;;  %v2320_v62 = vld [vmem:[#allocation5 + $0x28] sm:$0xff] }
  0xd2   :  { %v658_v34 = vrot.slane %v613_v30, 4  ;;  %1440 = vmatpush.bf16.msrb.mxu0 %v2322_v28 }
  0xd3   :  { %v629_v33 = vadd.f32 %v628_v29, %v608_v20  ;;  %v650_v39 = vrot.slane %v649_v32, 1  ;;  %v2330_v29 = vld [vmem:[#allocation5 + $0x78] sm:$0xff]  ;;  %v698_v61 = vrot.slane %v697_v19, 1 }
  0xd4   :  { %v503_v37 = vpop.f32.mrf.mxu2  ;;  %v659_v41 = vadd.f32 %v658_v34, %v613_v30  ;;  %v2346_v34 = vld [vmem:[#allocation5 + $0xf8] sm:$0xff]  ;;  %1453 = vmatpush.bf16.msra.mxu1 %v2330_v29 }
  0xd5   :  { %v630_v40 = vrot.slane %v629_v33, 2  ;;  %v568_v42 = vpop.f32.mrf.mxu3  ;;  %v651_v12 = vadd.f32 %v650_v39, %v649_v32  ;;  %v690_v32 = vrot.slane %v689_v13, 2  ;;  %1479 = vmatpush.bf16.msra.mxu3 %v2346_v34  ;;  %v699_v27 = vadd.f32 %v698_v61, %v697_v19  ;;  %v2343_v19 = vld [vmem:[#allocation5 + $0xe0] sm:$0xff] }
  0xd6   :  { %v660_v46 = vrot.slane %v659_v41, 2  ;;  %1441 = vmatpush.bf16.msrb.mxu0 %v2321_v43  ;;  %v2325_v43 = vld [vmem:[#allocation5 + $0x50] sm:$0xff] }
  0xd7   :  { %v631_v45 = vadd.f32 %v630_v40, %v629_v33  ;;  %v669_v48 = vmul.f32 0.125, %v651_v12  ;;  %v709_v33 = vadd.f32 %v708_v55, %v707_v4  ;;  %v2329_v12 = vld [vmem:[#allocation5 + $0x70] sm:$0xff]  ;;  %v2344_v4 = vld [vmem:[#allocation5 + $0xe8] sm:$0xff]  ;;  %v737_v10 = vmul.f32 0.125, %v699_v27  ;;  %v2319_v55 = vld [vmem:[#allocation5 + $0x20] sm:$0xff] }
  0xd8   :  { %v661_v52 = vadd.f32 %v660_v46, %v659_v41  ;;  %1454 = vmatpush.bf16.msra.mxu1 %v2329_v12  ;;  %v2333_v12 = vld [vmem:[#allocation5 + $0x90] sm:$0xff] }
  0xd9   :  { %v632_v49 = vrot.slane %v631_v45, 1  ;;  %v2722_v38 = vsub.f32 %v611_v7, %v669_v48  ;;  %v710_v46 = vrot.slane %v709_v33, 1  ;;  %v2337_v48 = vld [vmem:[#allocation5 + $0xb0] sm:$0xff] }
  0xda   :  { %v662_v58 = vrot.slane %v661_v52, 1  ;;  %1467 = vmatpush.bf16.msrb.mxu2 %v2337_v48  ;;  %1442 = vmatpush.bf16.msrb.mxu0 %v2320_v62  ;;  %v2316_v48 = vld [vmem:[#allocation5 + $0x8] sm:$0xff]  ;;  %v2323_v62 = vld [vmem:[#allocation5 + $0x40] sm:$0xff] }
  0xdb   :  { %v633_v57 = vadd.f32 %v632_v49, %v631_v45  ;;  %v685_v0 = vmul.f32 %v2722_v38, %v2722_v38  ;;  %v691_v45 = vadd.f32 %v690_v32, %v689_v13  ;;  %v2345_v49 = vld [vmem:[#allocation5 + $0xf0] sm:$0xff]  ;;  %v2326_v32 = vld [vmem:[#allocation5 + $0x58] sm:$0xff] }
  0xdc   :  { %v663_v3 = vadd.f32 %v662_v58, %v661_v52  ;;  %1480 = vmatpush.bf16.msra.mxu3 %v2345_v49  ;;  %1455 = vmatpush.bf16.msra.mxu1 %v2328_v63  ;;  %v2324_v49 = vld [vmem:[#allocation5 + $0x48] sm:$0xff]  ;;  %v2331_v63 = vld [vmem:[#allocation5 + $0x80] sm:$0xff] }
  0xdd   :  { %v666_v2 = vmul.f32 0.125, %v633_v57  ;;  %v718_v1 = vrot.slane %v685_v0, 4 }
  0xde   :  { %v671_v7 = vmul.f32 0.125, %v663_v3  ;;  %v711_v3 = vadd.f32 %v710_v46, %v709_v33  ;;  %1443 = vmatpush.bf16.msrb.mxu0 %v2319_v55  ;;  %v2334_v33 = vld [vmem:[#allocation5 + $0x98] sm:$0xff] }
  0xdf   :  { %v2728_v6 = vsub.f32 %v608_v20, %v666_v2  ;;  %v719_v11 = vadd.f32 %v718_v1, %v685_v0  ;;  %v714_v20 = vrot.slane %v713_v8, 2  ;;  %v2336_v0 = vld [vmem:[#allocation5 + $0xa8] sm:$0xff]  ;;  %v692_v2 = vrot.slane %v691_v45, 1 }
  0xe0   :  { %v2732_v15 = vsub.f32 %v613_v30, %v671_v7  ;;  %1468 = vmatpush.bf16.msrb.mxu2 %v2336_v0  ;;  %1481 = vmatpush.bf16.msra.mxu3 %v2344_v4  ;;  %v2362_v4 = vld [vmem:[#allocation5 + $0x178] sm:$0xff] }
  0xe1   :  { %v682_v14 = vmul.f32 %v2728_v6, %v2728_v6  ;;  %v720_v16 = vrot.slane %v719_v11, 2  ;;  %v715_v39 = vadd.f32 %v714_v20, %v713_v8 }
  0xe2   :  { %v687_v23 = vmul.f32 %v2732_v15, %v2732_v15  ;;  %1444 = vmatpush.bf16.msrb.mxu0 %v2318_v31  ;;  %v2377_v31 = vld [vmem:[#allocation5 + $0x1f0] sm:$0xff] }
  0xe3   :  { %v700_v21 = vrot.slane %v682_v14, 4  ;;  %v721_v35 = vadd.f32 %v720_v16, %v719_v11  ;;  %v716_v56 = vrot.slane %v715_v39, 1  ;;  %v2335_v16 = vld [vmem:[#allocation5 + $0xa0] sm:$0xff] }
  0xe4   :  { %v730_v37 = vrot.slane %v687_v23, 4  ;;  %1469 = vmatpush.bf16.msrb.mxu2 %v2335_v16  ;;  %1482 = vmatpush.bf16.msra.mxu3 %v2343_v19  ;;  %v2361_v19 = vld [vmem:[#allocation5 + $0x170] sm:$0xff] }
  0xe5   :  { %v701_v30 = vadd.f32 %v700_v21, %v682_v14  ;;  %v722_v52 = vrot.slane %v721_v35, 1  ;;  %v717_v5 = vadd.f32 %v716_v56, %v715_v39  ;;  %v2327_v14 = vld [vmem:[#allocation5 + $0x60] sm:$0xff] }
  0xe6   :  { %v731_v41 = vadd.f32 %v730_v37, %v687_v23  ;;  %1456 = vmatpush.bf16.msra.mxu1 %v2327_v14 }
  0xe7   :  { %v702_v40 = vrot.slane %v701_v30, 2  ;;  %v723_v1 = vadd.f32 %v722_v52, %v721_v35  ;;  %v740_v23 = vmul.f32 0.125, %v717_v5  ;;  %v2342_v35 = vld [vmem:[#allocation5 + $0xd8] sm:$0xff]  ;;  %v2332_v52 = vld [vmem:[#allocation5 + $0x88] sm:$0xff] }
  0xe8   :  { %v553_v22 = vpop.f32.mrf.mxu2  ;;  %v732_v53 = vrot.slane %v731_v41, 2  ;;  %1470 = vmatpush.bf16.msrb.mxu2 %v2334_v33  ;;  %1483 = vmatpush.bf16.msra.mxu3 %v2342_v35  ;;  %v2370_v5 = vld [vmem:[#allocation5 + $0x1b8] sm:$0xff]  ;;  %v2352_v35 = vld [vmem:[#allocation5 + $0x128] sm:$0xff] }
  0xe9   :  { %v554_v24 = vadd.f32 %v553_v22, %v175_v17  ;;  %v703_v25 = vadd.f32 %v702_v40, %v701_v30  ;;  %v693_v17 = vadd.f32 %v692_v2, %v691_v45  ;;  %v741_v20 = vmul.f32 0.125, %v723_v1  ;;  %v2341_v45 = vld [vmem:[#allocation5 + $0xd0] sm:$0xff] }
  0xea   :  { %v733_v26 = vadd.f32 %v732_v53, %v731_v41  ;;  %v2742_v22 = vadd.f32 1e-05, %v737_v10  ;;  %1457 = vmatpush.bf16.msra.mxu1 %v2326_v32  ;;  %v2754_v39 = vadd.f32 1e-05, %v740_v23 }
  0xeb   :  { %v2738_v51 = vadd.f32 %v604_v18, %v554_v24  ;;  %v704_v57 = vrot.slane %v703_v25, 1  ;;  %v739_v18 = vmul.f32 0.125, %v711_v3  ;;  %v736_v30 = vmul.f32 0.125, %v693_v17  ;;  %v2339_v3 = vld [vmem:[#allocation5 + $0xc0] sm:$0xff] }
  0xec   :  { %v734_v7 = vrot.slane %v733_v26, 1  ;;  %v2748_v37 = vadd.f32 1e-05, %v741_v20  ;;  %2401 = vrsqrt.f32 %v2742_v22  ;;  %1471 = vmatpush.bf16.msrb.mxu2 %v2333_v12  ;;  %1484 = vmatpush.bf16.msra.mxu3 %v2341_v45  ;;  %v2369_v20 = vld [vmem:[#allocation5 + $0x1b0] sm:$0xff]  ;;  %v2368_v12 = vld [vmem:[#allocation5 + $0x1a8] sm:$0xff]  ;;  %vm768_vm2 = vweird.f32 %v2742_v22 }
  0xed   :  { %v652_v42 = vrot.slane %v2738_v51, 4  ;;  %v705_v50 = vadd.f32 %v704_v57, %v703_v25  ;;  %v2746_v34 = vadd.f32 1e-05, %v739_v18  ;;  %v2353_v18 = vld [vmem:[#allocation5 + $0x130] sm:$0xff]  ;;  %v2376_v45 = vld [vmem:[#allocation5 + $0x1e8] sm:$0xff]  ;;  %vm798_vm6 = vweird.f32 %v2754_v39 }
  0xee   :  { %v735_v11 = vadd.f32 %v734_v7, %v733_v26  ;;  %1458 = vmatpush.bf16.msra.mxu1 %v2325_v43  ;;  %vm808_vm13 = vweird.f32 %v2748_v37 }
  0xef   :  { %v653_v54 = vadd.f32 %v652_v42, %v2738_v51  ;;  %v738_v8 = vmul.f32 0.125, %v705_v50  ;;  %v2317_v42 = vld [vmem:[#allocation5 + $0x10] sm:$0xff]  ;;  %v2354_v50 = vld [vmem:[#allocation5 + $0x138] sm:$0xff]  ;;  %vm788_vm4 = vweird.f32 %v2746_v34 }
  0xf0   :  { %v555_v58 = vpop.f32.mrf.mxu2  ;;  %v743_v28 = vmul.f32 0.125, %v735_v11  ;;  %1445 = vmatpush.bf16.msrb.mxu0 %v2317_v42  ;;  %1472 = vmatpush.bf16.msrb.mxu2 %v2332_v52 }
  0xf1   :  { %v654_v60 = vrot.slane %v653_v54, 2  ;;  %v2744_v24 = vadd.f32 1e-05, %v738_v8  ;;  %v2378_v8 = vld [vmem:[#allocation5 + $0x1f8] sm:$0xff] }
  0xf2   :  { %v2757_v40 = vadd.f32 1e-05, %v743_v28  ;;  %v2767_v53 = vpop.eup %2401  ;;  %1459 = vmatpush.bf16.msra.mxu1 %v2324_v49 }
  0xf3   :  { %v655_v9 = vadd.f32 %v654_v60, %v653_v54  ;;  %2403 = vrsqrt.f32 %v2744_v24  ;;  %v2340_v54 = vld [vmem:[#allocation5 + $0xc8] sm:$0xff]  ;;  %v2315_v60 = vld [vmem:[#allocation5] sm:$0xff]  ;;  %v763_v7 = vmul.f32 %v2767_v53, %v2742_v22  ;;  %vm769_vm3 = vweird.f32 %v2767_v53 }
  0xf4   :  { %2405 = vrsqrt.f32 %v2746_v34  ;;  %1446 = vmatpush.bf16.msrb.mxu0 %v2316_v48  ;;  %1485 = vmatpush.bf16.msra.mxu3 %v2340_v54  ;;  %v2351_v54 = vld [vmem:[#allocation5 + $0x120] sm:$0xff]  ;;  %vm2822_vm8 = vmor %vm768_vm2, %vm769_vm3  ;;  %vm778_vm12 = vweird.f32 %v2744_v24 }
  0xf5   :  { %v656_v13 = vrot.slane %v655_v9, 1  ;;  %2407 = vrsqrt.f32 %v2748_v37  ;;  %1473 = vmatpush.bf16.msrb.mxu2 %v2331_v63  ;;  %v2375_v63 = vld [vmem:[#allocation5 + $0x1e0] sm:$0xff] }
  0xf6   :  { %2409 = vrsqrt.f32 %v2754_v39  ;;  %1460 = vmatpush.bf16.msra.mxu1 %v2323_v62  ;;  %v2367_v62 = vld [vmem:[#allocation5 + $0x1a0] sm:$0xff] }
  0xf7   :  { %v657_v21 = vadd.f32 %v656_v13, %v655_v9  ;;  %2411 = vrsqrt.f32 %v2757_v40 }
  0xf8   :  { %1447 = vmatpush.bf16.msrb.mxu0 %v2315_v60  ;;  %1486 = vmatpush.bf16.msra.mxu3 %v2339_v3 }
  0xf9   :  { %v670_v29 = vmul.f32 0.125, %v657_v21  ;;  %v2770_v27 = vpop.eup %2403  ;;  %1518 = vmatpush.bf16.msra.mxu2 %v2370_v5  ;;  %v764_v21 = vmul.f32 %v2767_v53, %v763_v7  ;;  %v2358_v5 = vld [vmem:[#allocation5 + $0x158] sm:$0xff] }
  0xfa   :  { %v2772_v57 = vpop.eup %2405  ;;  %v773_v2 = vmul.f32 %v2770_v27, %v2744_v24  ;;  %1505 = vmatpush.bf16.msrb.mxu1 %v2362_v4  ;;  %vm779_vm7 = vweird.f32 %v2770_v27 }
  0xfb   :  { %v2751_v61 = vsub.f32 %v2738_v51, %v670_v29  ;;  %v2761_v51 = vadd.f32 1e-05, %v736_v30  ;;  %v2774_v58 = vpop.eup %2407  ;;  %v783_v9 = vmul.f32 %v2772_v57, %v2746_v34  ;;  %vm789_vm5 = vweird.f32 %v2772_v57  ;;  %vm2844_vm14 = vmor %vm778_vm12, %vm779_vm7 }
  0xfc   :  { %v2776_v0 = vpop.eup %2409  ;;  %v803_v13 = vmul.f32 %v2774_v58, %v2748_v37  ;;  %1492 = vmatpush.bf16.msra.mxu0 %v2354_v50  ;;  %v774_v16 = vmul.f32 %v2770_v27, %v773_v2  ;;  %1531 = vmatpush.bf16.msrb.mxu3 %v2378_v8  ;;  %vm2832_vm10 = vmor %vm788_vm4, %vm789_vm5  ;;  %vm809_vm11 = vweird.f32 %v2774_v58  ;;  %vm828_vm4 = vweird.f32 %v2757_v40 }
  0xfd   :  { %v686_v41 = vmul.f32 %v2751_v61, %v2751_v61  ;;  %2413 = vrsqrt.f32 %v2761_v51  ;;  %v2780_v1 = vpop.eup %2411  ;;  %v793_v55 = vmul.f32 %v2776_v0, %v2754_v39  ;;  %v784_v28 = vmul.f32 %v2772_v57, %v783_v9  ;;  %1519 = vmatpush.bf16.msra.mxu2 %v2369_v20  ;;  %vm2871_vm3 = vmor %vm808_vm13, %vm809_vm11 }
  0xfe   :  { %v823_v17 = vmul.f32 %v2780_v1, %v2757_v40  ;;  %v804_v32 = vmul.f32 %v2774_v58, %v803_v13  ;;  %1506 = vmatpush.bf16.msrb.mxu1 %v2361_v19  ;;  %v775_v42 = vmul.f32 0.5, %v774_v16  ;;  %v2374_v16 = vld [vmem:[#allocation5 + $0x1d8] sm:$0xff]  ;;  %vm799_vm9 = vweird.f32 %v2776_v0  ;;  %v2348_v40 = vld [vmem:[#allocation5 + $0x108] sm:$0xff] }
  0xff   :  { %v724_v46 = vrot.slane %v686_v41, 4  ;;  %v794_v33 = vmul.f32 %v2776_v0, %v793_v55  ;;  %v785_v48 = vmul.f32 0.5, %v784_v28  ;;  %vm2850_vm15 = vmor %vm798_vm6, %vm799_vm9  ;;  %vm829_vm1 = vweird.f32 %v2780_v1 }
 0x100   :  { %1493 = vmatpush.bf16.msra.mxu0 %v2353_v18  ;;  %v824_v43 = vmul.f32 %v2780_v1, %v823_v17  ;;  %1532 = vmatpush.bf16.msrb.mxu3 %v2377_v31  ;;  %v805_v49 = vmul.f32 0.5, %v804_v32  ;;  %v2357_v31 = vld [vmem:[#allocation5 + $0x150] sm:$0xff]  ;;  %vm758_vm6 = vweird.f32 %v2761_v51  ;;  %vm847_vm7 = vcmask 1040384  }
 0x101   :  { %v725_v25 = vadd.f32 %v724_v46, %v686_v41  ;;  %v2360_v41 = vld [vmem:[#allocation5 + $0x168] sm:$0xff]  ;;  %v765_v46 = vmul.f32 0.5, %v764_v21  ;;  %v795_v52 = vmul.f32 0.5, %v794_v33  ;;  %1520 = vmatpush.bf16.msra.mxu2 %v2368_v12  ;;  %v786_v50 = vsub.f32 1.5, %v785_v48 }
 0x102   :  { %1507 = vmatpush.bf16.msrb.mxu1 %v2360_v41  ;;  %v825_v60 = vmul.f32 0.5, %v824_v43  ;;  %v806_v4 = vsub.f32 1.5, %v805_v49  ;;  %v2365_v41 = vld [vmem:[#allocation5 + $0x190] sm:$0xff]  ;;  %v2364_v48 = vld [vmem:[#allocation5 + $0x188] sm:$0xff]  ;;  %vm852_vm12 = vcmask 1044484  }
 0x103   :  { %v726_v56 = vrot.slane %v725_v25, 2  ;;  %v2786_v11 = vpop.eup %2413  ;;  %v766_v2 = vsub.f32 1.5, %v765_v46  ;;  %v796_v9 = vsub.f32 1.5, %v795_v52  ;;  %v787_v20 = vmul.f32 %v2772_v57, %v786_v50  ;;  %v2372_v49 = vld [vmem:[#allocation5 + $0x1c8] sm:$0xff]  ;;  %v2363_v50 = vld [vmem:[#allocation5 + $0x180] sm:$0xff] }
 0x104   :  { %v753_v23 = vmul.f32 %v2786_v11, %v2761_v51  ;;  %1494 = vmatpush.bf16.msra.mxu0 %v2352_v35  ;;  %1533 = vmatpush.bf16.msrb.mxu3 %v2376_v45  ;;  %v826_v13 = vsub.f32 1.5, %v825_v60  ;;  %vm759_vm2 = vweird.f32 %v2786_v11 }
 0x105   :  { %v727_v26 = vadd.f32 %v726_v56, %v725_v25  ;;  %v2359_v56 = vld [vmem:[#allocation5 + $0x160] sm:$0xff]  ;;  %1521 = vmatpush.bf16.msra.mxu2 %v2367_v62  ;;  %v767_v17 = vmul.f32 %v2767_v53, %v766_v2  ;;  %v797_v28 = vmul.f32 %v2776_v0, %v796_v9  ;;  %vm2892_vm9 = vmor %vm758_vm6, %vm759_vm2 }
 0x106   :  { %v754_v25 = vmul.f32 %v2786_v11, %v753_v23  ;;  %1508 = vmatpush.bf16.msrb.mxu1 %v2359_v56  ;;  %v807_v23 = vmul.f32 %v2774_v58, %v806_v4  ;;  %v827_v33 = vmul.f32 %v2780_v1, %v826_v13  ;;  %v2347_v2 = vld [vmem:[#allocation5 + $0x100] sm:$0xff] }
 0x107   :  { %v728_v10 = vrot.slane %v727_v26, 1  ;;  %v771_v39 = vsel %vm2822_vm8, %v2767_v53, %v767_v17  ;;  %v801_v37 = vsel %vm2850_vm15, %v2776_v0, %v797_v28  ;;  %vm2886_vm8 = vmor %vm828_vm4, %vm829_vm1  ;;  %vm856_vm15 = vcmask 1045508   ;;  %v2371_v4 = vld [vmem:[#allocation5 + $0x1c0] sm:$0xff] }
 0x108   :  { %v755_v3 = vmul.f32 0.5, %v754_v25  ;;  %1495 = vmatpush.bf16.msra.mxu0 %v2351_v54  ;;  %1534 = vmatpush.bf16.msrb.mxu3 %v2375_v63  ;;  %v811_v53 = vsel %vm2871_vm3, %v2774_v58, %v807_v23  ;;  %v2356_v58 = vld [vmem:[#allocation5 + $0x148] sm:$0xff]  ;;  %v831_v0 = vsel %vm2886_vm8, %v2780_v1, %v827_v33  ;;  %v840_v52 = vrot.slane %v771_v39, 7  ;;  %v615_v13 = vld [vmem:[%s3000_s5] sm:$0xff] }
 0x109   :  { %v729_v14 = vadd.f32 %v728_v10, %v727_v26  ;;  %v776_v26 = vsub.f32 1.5, %v775_v42  ;;  %v2350_v10 = vld [vmem:[#allocation5 + $0x118] sm:$0xff]  ;;  %v2373_v42 = vld [vmem:[#allocation5 + $0x1d0] sm:$0xff]  ;;  %v844_v56 = vrot.slane %v811_v53, 3  ;;  %v843_v1 = vrot.slane %v801_v37, 4 }
 0x10a   :  { %v756_v19 = vsub.f32 1.5, %v755_v3  ;;  %1509 = vmatpush.bf16.msrb.mxu1 %v2358_v5  ;;  %v846_v62 = vrot.slane %v831_v0, 1  ;;  %v2355_v3 = vld [vmem:[#allocation5 + $0x140] sm:$0xff]  ;;  %vm858_vm1 = vcmask 1043456   ;;  %v889_v17 = vperm.slane %v615_v13, 1 }
 0x10b   :  { %v742_v29 = vmul.f32 0.125, %v729_v14  ;;  %v777_v8 = vmul.f32 %v2770_v27, %v776_v26  ;;  %v2366_v14 = vld [vmem:[#allocation5 + $0x198] sm:$0xff]  ;;  %v853_v9 = vsel %vm852_vm12, %v843_v1, %v844_v56  ;;  %v890_v21 = vperm.slane %v615_v13, 2 }
 0x10c   :  { %1496 = vmatpush.bf16.msra.mxu0 %v2350_v10  ;;  %1522 = vmatpush.bf16.msra.mxu2 %v2366_v14  ;;  %v757_v43 = vmul.f32 %v2786_v11, %v756_v19  ;;  %v894_v51 = vperm.slane %v615_v13, 6  ;;  %vm1663_vm4 = vcmask 523264  }
 0x10d   :  { %v2801_v30 = vadd.f32 1e-05, %v742_v29  ;;  %v2349_v29 = vld [vmem:[#allocation5 + $0x110] sm:$0xff]  ;;  %v781_v32 = vsel %vm2844_vm14, %v2770_v27, %v777_v8  ;;  %1535 = vmatpush.bf16.msrb.mxu3 %v2374_v16  ;;  %v791_v27 = vsel %vm2832_vm10, %v2772_v57, %v787_v20  ;;  %vm849_vm10 = vcmask 1042434  }
 0x10e   :  { %v841_v57 = vrot.slane %v781_v32, 6  ;;  %1510 = vmatpush.bf16.msrb.mxu1 %v2357_v31  ;;  %v842_v54 = vrot.slane %v791_v27, 5  ;;  %v761_v26 = vsel %vm2892_vm9, %v2786_v11, %v757_v43  ;;  %vm854_vm14 = vcmask 1046534  }
 0x10f   :  { %2415 = vrsqrt.f32 %v2801_v30  ;;  %vm818_vm11 = vweird.f32 %v2801_v30  ;;  %v848_v11 = vsel %vm847_vm7, %v761_v26, %v840_v52  ;;  %v888_v16 = vperm.slane %v615_v13, 0 }
 0x110   :  { %1497 = vmatpush.bf16.msra.mxu0 %v2349_v29  ;;  %1523 = vmatpush.bf16.msra.mxu2 %v2365_v41 }
 0x111   :  { %1536 = vmatpush.bf16.msrb.mxu3 %v2373_v42 }
 0x112   :  { %1511 = vmatpush.bf16.msrb.mxu1 %v2356_v58 }
 0x114   :  { %1498 = vmatpush.bf16.msra.mxu0 %v2348_v40  ;;  %1524 = vmatpush.bf16.msra.mxu2 %v2364_v48  ;;  %v893_v40 = vperm.slane %v615_v13, 5 }
 0x115   :  { %v2808_v7 = vpop.eup %2415  ;;  %1537 = vmatpush.bf16.msrb.mxu3 %v2372_v49 }
 0x116   :  { %v813_v55 = vmul.f32 %v2808_v7, %v2801_v30  ;;  %vm819_vm5 = vweird.f32 %v2808_v7  ;;  %v850_v30 = vsel %vm849_vm10, %v841_v57, %v842_v54  ;;  %1512 = vmatpush.bf16.msrb.mxu1 %v2355_v3 }
 0x117   :  { %vm820_vm13 = vmor %vm818_vm11, %vm819_vm5  ;;  %v851_v5 = vsel %vm441_vm0, %v848_v11, %v850_v30  ;;  %vm1757_vm11 = vcmask 39936  }
 0x118   :  { %v814_v22 = vmul.f32 %v2808_v7, %v813_v55  ;;  %1499 = vmatpush.bf16.msra.mxu0 %v2347_v2  ;;  %1525 = vmatpush.bf16.msra.mxu2 %v2363_v50 }
 0x119   :  { %1538 = vmatpush.bf16.msrb.mxu3 %v2371_v4 }
 0x11a   :  { %v815_v35 = vmul.f32 0.5, %v814_v22  ;;  %v891_v22 = vperm.slane %v615_v13, 3 }
 0x11c   :  { %v816_v45 = vsub.f32 1.5, %v815_v35 }
 0x11e   :  { %v817_v25 = vmul.f32 %v2808_v7, %v816_v45 }
 0x120   :  { %v821_v60 = vsel %vm820_vm13, %v2808_v7, %v817_v25  ;;  %v614_v7 = vld [vmem:[%s2999_s4] sm:$0xff]  ;;  %v895_v25 = vperm.slane %v615_v13, 7 }
 0x121   :  { %v845_v63 = vrot.slane %v821_v60, 2 }
 0x123   :  { %v855_v10 = vsel %vm854_vm14, %v845_v63, %v846_v62 }
 0x124   :  { %v857_v8 = vsel %vm856_vm15, %v853_v9, %v855_v10 }
 0x125   :  { %v859_v55 = vsel %vm858_vm1, %v851_v5, %v857_v8 }
 0x126   :  { %v861_v14 = vmul.f32 %v859_v55, %v614_v7 }
 0x128   :  { %v863_v18 = vperm.slane %v861_v14, 0  ;;  %v864_v19 = vperm.slane %v861_v14, 1  ;;  %v865_v20 = vperm.slane %v861_v14, 2  ;;  %v866_v23 = vperm.slane %v861_v14, 3 }
 0x129   :  { %v867_v27 = vperm.slane %v861_v14, 4  ;;  %v868_v37 = vperm.slane %v861_v14, 5 }
 0x12a   :  { %v879_v28 = vmul.f32 %v863_v18, %v2714_v47  ;;  %v880_v34 = vmul.f32 %v864_v19, %v2703_v59  ;;  %v881_v29 = vmul.f32 %v865_v20, %v2728_v6  ;;  %v882_v31 = vmul.f32 %v866_v23, %v2706_v36 }
 0x12b   :  { %v869_v47 = vperm.slane %v861_v14, 6  ;;  %v870_v59 = vperm.slane %v861_v14, 7  ;;  %v883_v36 = vmul.f32 %v867_v27, %v2711_v44  ;;  %v892_v6 = vperm.slane %v615_v13, 4 }
 0x12c   :  { %v904_v24 = vadd.f32 %v888_v16, %v879_v28  ;;  %v905_v32 = vadd.f32 %v889_v17, %v880_v34  ;;  %v906_v33 = vadd.f32 %v890_v21, %v881_v29  ;;  %v907_v35 = vadd.f32 %v891_v22, %v882_v31  ;;  %v2386_v34 = vld [vmem:[%s3004_s9 + $0x38] sm:$0xff] }
 0x12d   :  { %v884_v46 = vmul.f32 %v868_v37, %v2722_v38  ;;  %v885_v58 = vmul.f32 %v869_v47, %v2751_v61  ;;  %v886_v0 = vmul.f32 %v870_v59, %v2732_v15  ;;  %v908_v48 = vadd.f32 %v892_v6, %v883_v36  ;;  %v2381_v37 = vld [vmem:[%s3004_s9 + $0x10] sm:$0xff]  ;;  %v2379_v6 = vld [vmem:[%s3004_s9] sm:$0xff] }
 0x12e   :  { %v912_v41 = vmax.f32 %v904_v24, 0.0  ;;  %v913_v42 = vmax.f32 %v905_v32, 0.0  ;;  %v914_v39 = vmax.f32 %v906_v33, 0.0  ;;  %v915_v43 = vmax.f32 %v907_v35, 0.0  ;;  %v2385_v24 = vld [vmem:[%s3004_s9 + $0x30] sm:$0xff]  ;;  %v2384_v35 = vld [vmem:[%s3004_s9 + $0x28] sm:$0xff] }
 0x12f   :  { %v909_v49 = vadd.f32 %v893_v40, %v884_v46  ;;  %v910_v52 = vadd.f32 %v894_v51, %v885_v58  ;;  %v911_v54 = vadd.f32 %v895_v25, %v886_v0  ;;  %v916_v56 = vmax.f32 %v908_v48, 0.0 }
 0x130   :  { %v920_v12 = vpack.c.bf16 %v912_v41, %v912_v41  ;;  %v921_v53 = vpack.c.bf16 %v913_v42, %v913_v42  ;;  %v922_v45 = vpack.c.bf16 %v914_v39, %v914_v39  ;;  %v923_v57 = vpack.c.bf16 %v915_v43, %v915_v43  ;;  %v2383_v39 = vld [vmem:[%s3004_s9 + $0x20] sm:$0xff] }
 0x131   :  { %v917_v26 = vmax.f32 %v909_v49, 0.0  ;;  %v918_v1 = vmax.f32 %v910_v52, 0.0  ;;  %v919_v60 = vmax.f32 %v911_v54, 0.0  ;;  %v924_v30 = vpack.c.bf16 %v916_v56, %v916_v56  ;;  %v1544_v49 = vld [vmem:[%s3002_s7] sm:$0x1] }
 0x132   :  { %1448 = vmatmul.bf16.vlgmr.msrb.gmra.mxu0 %v920_v12  ;;  %1461 = vmatmul.bf16.vlgmr.msra.gmra.mxu1 %v921_v53  ;;  %v2382_v12 = vld [vmem:[%s3004_s9 + $0x18] sm:$0xff] }
 0x133   :  { %1474 = vmatmul.bf16.vlgmr.msrb.gmra.mxu2 %v922_v45  ;;  %1487 = vmatmul.bf16.vlgmr.msra.gmra.mxu3 %v923_v57  ;;  %v925_v44 = vpack.c.bf16 %v917_v26, %v917_v26  ;;  %v926_v62 = vpack.c.bf16 %v918_v1, %v918_v1  ;;  %v927_v63 = vpack.c.bf16 %v919_v60, %v919_v60  ;;  %v2380_v57 = vld [vmem:[%s3004_s9 + $0x8] sm:$0xff]  ;;  %v2398_v1 = vld [vmem:[%s3003_s8] ss:$0 sm:$0xff] }
 0x134   :  { %1648 = vmatpush.bf16.msrb.mxu0 %v2386_v34 }
 0x138   :  { %1649 = vmatpush.bf16.msrb.mxu0 %v2385_v24 }
 0x13c   :  { %1650 = vmatpush.bf16.msrb.mxu0 %v2384_v35 }
 0x140   :  { %1651 = vmatpush.bf16.msrb.mxu0 %v2383_v39 }
 0x142   :  { %1500 = vmatmul.bf16.vlgmr.msra.gmra.mxu0 %v924_v30  ;;  %1513 = vmatmul.bf16.vlgmr.msrb.gmra.mxu1 %v925_v44 }
 0x143   :  { %1526 = vmatmul.bf16.vlgmr.msra.gmra.mxu2 %v926_v62  ;;  %1539 = vmatmul.bf16.vlgmr.msrb.gmra.mxu3 %v927_v63 }
 0x144   :  { %1652 = vmatpush.bf16.msrb.mxu0 %v2382_v12 }
 0x148   :  { %1653 = vmatpush.bf16.msrb.mxu0 %v2381_v37 }
 0x14c   :  { %1654 = vmatpush.bf16.msrb.mxu0 %v2380_v57  ;;  %v2400_v57 = vld [vmem:[%s3008_s13] ss:$0 sm:$0xff]  ;;  %s1766_s13 = sshll.u32 %s3009_s14, 4  ;;  %s1767_s13 = int_to_ptr.hbm [resolvable:$true] %s1766_s13 }
 0x150   :  { %1655 = vmatpush.bf16.msrb.mxu0 %v2379_v6 }
 0x1af   :  { %v1449_v38 = vpop.f32.mrf.mxu0  ;;  %v1462_v61 = vpop.f32.mrf.mxu1 }
 0x1b0   :  { %v1463_v4 = vadd.f32 %v1462_v61, %v1449_v38 }
 0x1b6   :  { %v1475_v15 = vpop.f32.mrf.mxu2  ;;  %v1488_v2 = vpop.f32.mrf.mxu3 }
 0x1b7   :  { %v1451_v3 = vpop.f32.mrf.mxu0  ;;  %v1464_v50 = vpop.f32.mrf.mxu1  ;;  %v1476_v11 = vadd.f32 %v1475_v15, %v1463_v4 }
 0x1b9   :  { %v1489_v10 = vadd.f32 %v1488_v2, %v1476_v11 }
 0x1be   :  { %v1477_v9 = vpop.f32.mrf.mxu2  ;;  %v1490_v7 = vpop.f32.mrf.mxu3 }
 0x1bf   :  { %v1501_v5 = vpop.f32.mrf.mxu0  ;;  %v1514_v8 = vpop.f32.mrf.mxu1 }
 0x1c0   :  { %v1502_v13 = vadd.f32 %v1501_v5, %v1489_v10 }
 0x1c2   :  { %v1515_v55 = vadd.f32 %v1514_v8, %v1502_v13  ;;  %v1710_v13 = vld [vmem:[%s3007_s12 + $0x38] sm:$0xff] }
 0x1c3   :  { %1726 = vmatpush.msra.mxu1 %v1710_v13 }
 0x1c6   :  { %v1527_v14 = vpop.f32.mrf.mxu2  ;;  %v1540_v16 = vpop.f32.mrf.mxu3 }
 0x1c7   :  { %v1528_v17 = vadd.f32 %v1527_v14, %v1515_v55  ;;  %v1503_v18 = vpop.f32.mrf.mxu0  ;;  %v1516_v19 = vpop.f32.mrf.mxu1  ;;  %v1709_v14 = vld [vmem:[%s3007_s12 + $0x30] sm:$0xff] }
 0x1c8   :  { %1727 = vmatpush.msra.mxu1 %v1709_v14  ;;  %v1707_v19 = vld [vmem:[%s3007_s12 + $0x20] sm:$0xff] }
 0x1c9   :  { %v1541_v20 = vadd.f32 %v1540_v16, %v1528_v17  ;;  %v1708_v17 = vld [vmem:[%s3007_s12 + $0x28] sm:$0xff] }
 0x1ca   :  { %1728 = vmatpush.msra.mxu1 %v1708_v17 }
 0x1cb   :  { %v1546_v21 = vrot.slane %v1541_v20, 4 }
 0x1cc   :  { %1729 = vmatpush.msra.mxu1 %v1707_v19 }
 0x1cd   :  { %v1547_v23 = vadd.f32 %v1546_v21, %v1541_v20  ;;  %v1706_v21 = vld [vmem:[%s3007_s12 + $0x18] sm:$0xff] }
 0x1ce   :  { %v1529_v22 = vpop.f32.mrf.mxu2  ;;  %v1542_v28 = vpop.f32.mrf.mxu3  ;;  %1730 = vmatpush.msra.mxu1 %v1706_v21 }
 0x1cf   :  { %v1548_v29 = vrot.slane %v1547_v23, 2  ;;  %v1705_v22 = vld [vmem:[%s3007_s12 + $0x10] sm:$0xff]  ;;  %v1704_v28 = vld [vmem:[%s3007_s12 + $0x8] sm:$0xff] }
 0x1d0   :  { %1731 = vmatpush.msra.mxu1 %v1705_v22 }
 0x1d1   :  { %v1549_v31 = vadd.f32 %v1548_v29, %v1547_v23  ;;  %v1703_v29 = vld [vmem:[%s3007_s12] sm:$0xff] }
 0x1d2   :  { %1732 = vmatpush.msra.mxu1 %v1704_v28 }
 0x1d3   :  { %v1550_v32 = vrot.slane %v1549_v31, 1 }
 0x1d4   :  { %1733 = vmatpush.msra.mxu1 %v1703_v29 }
 0x1d5   :  { %v1551_v33 = vadd.f32 %v1550_v32, %v1549_v31 }
 0x1d7   :  { %v1552_v41 = vmul.f32 0.125, %v1551_v33 }
 0x1d9   :  { %v1553_v42 = vsub.f32 %v1541_v20, %v1552_v41 }
 0x1db   :  { %v1554_v43 = vmul.f32 %v1553_v42, %v1553_v42 }
 0x1dd   :  { %v1555_v27 = vrot.slane %v1554_v43, 4 }
 0x1df   :  { %v1556_v53 = vadd.f32 %v1555_v27, %v1554_v43 }
 0x1e1   :  { %v1557_v45 = vrot.slane %v1556_v53, 2 }
 0x1e3   :  { %v1558_v47 = vadd.f32 %v1557_v45, %v1556_v53  ;;  %v2399_v53 = vld [vmem:[%s3006_s11] ss:$0 sm:$0xff] }
 0x1e5   :  { %v1559_v59 = vrot.slane %v1558_v47, 1 }
 0x1e7   :  { %v1560_v36 = vadd.f32 %v1559_v59, %v1558_v47 }
 0x1e9   :  { %v1561_v46 = vmul.f32 0.125, %v1560_v36 }
 0x1eb   :  { %v1562_v40 = vadd.f32 1e-05, %v1561_v46 }
 0x1ed   :  { %2417 = vrsqrt.f32 %v1562_v40  ;;  %vm1569_vm2 = vweird.f32 %v1562_v40 }
 0x1f3   :  { %v2418_v58 = vpop.eup %2417 }
 0x1f4   :  { %v1564_v51 = vmul.f32 %v2418_v58, %v1562_v40  ;;  %vm1570_vm0 = vweird.f32 %v2418_v58 }
 0x1f5   :  { %vm1571_vm3 = vmor %vm1569_vm2, %vm1570_vm0 }
 0x1f6   :  { %v1565_v0 = vmul.f32 %v2418_v58, %v1564_v51 }
 0x1f8   :  { %v1566_v25 = vmul.f32 0.5, %v1565_v0 }
 0x1fa   :  { %v1567_v48 = vsub.f32 1.5, %v1566_v25 }
 0x1fc   :  { %v1568_v52 = vmul.f32 %v2418_v58, %v1567_v48 }
 0x1fe   :  { %v1572_v54 = vsel %vm1571_vm3, %v2418_v58, %v1568_v52 }
 0x1ff   :  { %v1573_v56 = vmul.f32 %v1572_v54, %v1544_v49 }
 0x201   :  { %v1575_v26 = vperm.slane %v1573_v56, 0 }
 0x203   :  { %v1577_v60 = vmul.f32 %v1575_v26, %v1553_v42  ;;  %v1661_v42 = vld [vmem:[%s3005_s10] sm:$0x1]  ;;  %s2511_s10 = smov [#allocation7]  }
 0x204   :  { %s1764_s11 = sshll.u32 %s2511_s10, 4  ;;  %s1765_s11 = int_to_ptr.vmem [resolvable:$true] %s1764_s11 }
 0x205   :  { %v1581_v30 = vadd.f32 %v2398_v1, %v1577_v60 }
 0x207   :  { %v1582_v44 = vmax.f32 %v1581_v30, 0.0 }
 0x209   :  { %v1583_v62 = vpack.c.bf16 %v1582_v44, %v1582_v44 }
 0x20b   :  { %1656 = vmatmul.bf16.vlgmr.msrb.gmra.mxu0 %v1583_v62 }
 0x288   :  { %v1657_v63 = vpop.f32.mrf.mxu0 }
 0x289   :  { %v1664_v38 = vsel %vm1663_vm4, %v1657_v63, 0.0 }
 0x28a   :  { %v1665_v61 = vrot.slane %v1664_v38, 4 }
 0x28c   :  { %v1666_v15 = vadd.f32 %v1665_v61, %v1664_v38 }
 0x28e   :  { %v1667_v2 = vrot.slane %v1666_v15, 2 }
 0x290   :  { %v1668_v3 = vadd.f32 %v1667_v2, %v1666_v15  ;;  %v1659_v50 = vpop.f32.mrf.mxu0 }
 0x292   :  { %v1669_v4 = vrot.slane %v1668_v3, 1 }
 0x294   :  { %v1670_v11 = vadd.f32 %v1669_v4, %v1668_v3 }
 0x296   :  { %v1671_v9 = vmul.f32 0.125, %v1670_v11 }
 0x298   :  { %v1672_v7 = vsub.f32 %v1657_v63, %v1671_v9 }
 0x29a   :  { %v1673_v10 = vmul.f32 %v1672_v7, %v1672_v7 }
 0x29c   :  { %v1674_v5 = vsel %vm1663_vm4, %v1673_v10, 0.0 }
 0x29d   :  { %v1675_v8 = vrot.slane %v1674_v5, 4 }
 0x29f   :  { %v1676_v55 = vadd.f32 %v1675_v8, %v1674_v5 }
 0x2a1   :  { %v1677_v16 = vrot.slane %v1676_v55, 2 }
 0x2a3   :  { %v1678_v18 = vadd.f32 %v1677_v16, %v1676_v55 }
 0x2a5   :  { %v1679_v20 = vrot.slane %v1678_v18, 1 }
 0x2a7   :  { %v1680_v23 = vadd.f32 %v1679_v20, %v1678_v18 }
 0x2a9   :  { %v1681_v34 = vmul.f32 0.125, %v1680_v23 }
 0x2ab   :  { %v1682_v31 = vadd.f32 1e-05, %v1681_v34 }
 0x2ad   :  { %2419 = vrsqrt.f32 %v1682_v31  ;;  %vm1689_vm6 = vweird.f32 %v1682_v31 }
 0x2b3   :  { %v2420_v24 = vpop.eup %2419 }
 0x2b4   :  { %v1684_v32 = vmul.f32 %v2420_v24, %v1682_v31  ;;  %vm1690_vm5 = vweird.f32 %v2420_v24 }
 0x2b5   :  { %vm1691_vm7 = vmor %vm1689_vm6, %vm1690_vm5 }
 0x2b6   :  { %v1685_v33 = vmul.f32 %v2420_v24, %v1684_v32 }
 0x2b8   :  { %v1686_v35 = vmul.f32 0.5, %v1685_v33 }
 0x2ba   :  { %v1687_v41 = vsub.f32 1.5, %v1686_v35 }
 0x2bc   :  { %v1688_v39 = vmul.f32 %v2420_v24, %v1687_v41 }
 0x2be   :  { %v1692_v43 = vsel %vm1691_vm7, %v2420_v24, %v1688_v39 }
 0x2bf   :  { %v1693_v27 = vmul.f32 %v1692_v43, %v1661_v42 }
 0x2c1   :  { %v1695_v12 = vperm.slane %v1693_v27, 0 }
 0x2c3   :  { %v1697_v45 = vmul.f32 %v1695_v12, %v1672_v7 }
 0x2c5   :  { %v1701_v37 = vadd.f32 %v2399_v53, %v1697_v45 }
 0x2c7   :  { %v1702_v47 = vmax.f32 %v1701_v37, 0.0 }
 0x2c9   :  { %2265 = vmatmul.msk.f32.vlgmr.msra.gmra.mxu1 %vm1663_vm4, %v1702_v47 }
 0x346   :  { %v1735_v59 = vpop.f32.mrf.mxu1 }
 0x347   :  { %v1736_v36 = vadd.f32 %v2400_v57, %v1735_v59 }
 0x349   :  { %v2266_v6 = vmul.f32 -1.442695, %v1736_v36 }
 0x34b   :  { %2421 = vpow2.f32 %v2266_v6 }
 0x351   :  { %v2422_v46 = vpop.eup %2421 }
 0x352   :  { %v1741_v40 = vadd.f32 1.0, %v2422_v46 }
 0x354   :  { %2423 = vrcp.f32 %v1741_v40  ;;  %v1753_v25 = vand.u32 2147483648, %v1741_v40  ;;  %v1751_v49 = vand.u32 2147483647, %v1741_v40  ;;  %vm1747_vm9 = vweird.f32 %v1741_v40 }
 0x356   :  { %v1754_v54 = vor.u32 1.1754944e-38, %v1753_v25  ;;  %vm1752_vm12 = vcmp.eq.f32.partialorder %v1751_v49, 8.507059e+37 }
 0x35a   :  { %v2424_v58 = vpop.eup %2423 }
 0x35b   :  { %v1743_v51 = vmul.f32 %v2424_v58, %v1741_v40  ;;  %vm1748_vm8 = vweird.f32 %v2424_v58 }
 0x35c   :  { %vm1749_vm10 = vmor %vm1747_vm9, %vm1748_vm8 }
 0x35d   :  { %v1744_v0 = vsub.f32 1.0, %v1743_v51 }
 0x35f   :  { %v1745_v48 = vmul.f32 %v2424_v58, %v1744_v0 }
 0x361   :  { %v1746_v52 = vadd.f32 %v2424_v58, %v1745_v48 }
 0x363   :  { %v1750_v56 = vsel %vm1749_vm10, %v2424_v58, %v1746_v52 }
 0x364   :  { %v1755_v26 = vsel %vm1752_vm12, %v1754_v54, %v1750_v56 }
 0x365   :  { %1758 = vst.msk [vmem:[#allocation7] sm:$0xff] %vm1757_vm11, %v1755_v26 }
 0x366   :  { %1769 = dma.vmem_to_hbm [thread:$0]  %s1765_s11, 128, %s1767_s13, [#allocation4]  }
 0x367   :  { %2501 = dma.done.wait [#allocation4], 128  }
 0x368   :  { %2502 = vsyncadd [#allocation4], 4294967168 }
 0x369   :  { %1774 = vsyncpa [#allocation3], 1 }
 0x36a   :  { %1775 = vsyncpa [#allocation6], 1 }
 0x36b   :  { %1776 = vsyncpa [#allocation4], 1 }

</bundles_post_ra>
